<compile_context>
chip_gen: v5e
topology: v5e:2x2
jax: 0.10.0
libtpu: 0.0.40
codegen_flags: <defaults>
</compile_context>

<pallas_src>
import jax
import jax.numpy as jnp
from jax.experimental import pallas as pl
from jax.experimental.pallas import tpu as pltpu


def feat_unfold(latent):
    """(B, N, D) -> (B, N, 3D): [prev | center | next] with edge replication."""
    prev = jnp.concatenate([latent[:, :1, :], latent[:, :-1, :]], axis=1)
    nxt = jnp.concatenate([latent[:, 1:, :], latent[:, -1:, :]], axis=1)
    return jnp.concatenate([prev, latent, nxt], axis=-1)


def lisa_query_kernel(coord_ref, ptot_ref, vecs_ref, w2_ref, w3_ref, b3_ref, out_ref):
    N = ptot_ref.shape[2]
    TQ = coord_ref.shape[2]

    c0 = coord_ref[0]          # (1, TQ)  original query coords, lane-dense
    ptot = ptot_ref[0]         # (H, N)   W1-projected unfolded latent (bf16), hoisted

    vecs = vecs_ref[...]       # (H, 3)   packed [w1_rel | b1 | b2] (f32)
    w1c = vecs[:, 0:1]
    b1 = vecs[:, 1:2]
    b2 = vecs[:, 2:3]

    rx = 1.0 / N               # = 2 / num_latents / 2
    eps = 1e-6

    # ---- fuse the two eval-path vx branches along the lane axis: [vx=-2 | vx=0] ----
    c_shift = jnp.concatenate([c0 + (-2.0 * rx + eps), c0 + eps], axis=1)   # (1, 2TQ)
    c_shift = jnp.clip(c_shift, -1.0 + 1e-6, 1.0 - 1e-6)
    c_orig = jnp.concatenate([c0, c0], axis=1)                              # (1, 2TQ)

    # ---- closed-form searchsorted on the uniform grid feat_coord[j] = -1 + (2j+1)/N
    def fc(i):  # feat_coord at (float) index i — same formula/rounding as reference
        return (2.0 * i.astype(jnp.float32) + 1.0) / N - 1.0

    t = (c_shift + 1.0) * (0.5 * N) - 0.5
    idx_g = jnp.clip(jnp.ceil(t), 0.0, float(N - 1)).astype(jnp.int32)      # guess (+-1)
    # Exact correction -> matches torch.searchsorted (left) + clamp(max=N-1).
    # NOTE: for extremely large N (~2^22+) the f32 estimate may be off by >1; widen the
    # correction there. fc(idx_g - 1) is evaluated at index -1 when idx_g == 0 — the
    # result is masked by (idx_g > 0), so it is only wasted compute, not a bug.
    up = (fc(idx_g) < c_shift) & (idx_g < N - 1)
    down = (fc(idx_g - 1) >= c_shift) & (idx_g > 0)
    idx = idx_g + up.astype(jnp.int32) - down.astype(jnp.int32)             # (1, 2TQ)

    q_coord = fc(idx)
    rel = (c_orig - q_coord) * N                                            # (1, 2TQ)

    # ---- gather via a bf16 one-hot matmul (exact 0/1), queries on the MXU lane axis
    # TODO(synk): scalar-prefetch row gather for production N >> TQ (see header).
    n_iota = jax.lax.broadcasted_iota(jnp.int32, (N, 2 * TQ), 0)
    onehot = (n_iota == idx).astype(jnp.bfloat16)                           # (N, 2TQ)

    h = jnp.dot(ptot, onehot, preferred_element_type=jnp.float32)           # (H, 2TQ)
    h = h + w1c * rel + b1
    h = jnp.maximum(h, 0.0)
    h = jnp.dot(w2_ref[...], h.astype(jnp.bfloat16),
                preferred_element_type=jnp.float32) + b2
    h = jnp.maximum(h, 0.0)
    pred = jnp.dot(w3_ref[...], h.astype(jnp.bfloat16),
                   preferred_element_type=jnp.float32) + b3_ref[0, 0]       # (1, 2TQ)

    # ---- split branches, area-weighted blend (local_ensemble swaps the weights) ----
    pred0, pred1 = pred[:, :TQ], pred[:, TQ:]
    rel0, rel1 = rel[:, :TQ], rel[:, TQ:]
    a0 = jnp.abs(rel0) + 1e-9
    a1 = jnp.abs(rel1) + 1e-9
    inv_tot = pl.reciprocal(a0 + a1, approx=True)          # EUP vrcp, free slot
    out_ref[0] = pred0 * (a1 * inv_tot) + pred1 * (a0 * inv_tot)


def lisa_query_rgb_pallas(coord, latent, params, *, tq=512):
    """coord: (B, Q, 1), latent: (B, N, D) -> (B, Q, 1)."""
    assert tq % 128 == 0, "tq must be a multiple of 128 for lane-dense tiling"
    w1c, w1f, b1, w2, b2, w3t, b3 = params
    B, Q, _ = coord.shape
    N = latent.shape[1]
    H = w2.shape[0]

    qp = ((Q + tq - 1) // tq) * tq
    c = coord[..., 0]                                   # (B, Q) lane-dense queries
    if qp != Q:
        c = jnp.pad(c, ((0, 0), (0, qp - Q)))           # pad with 0-coords, sliced below
    c = c.reshape(B, 1, qp)

    # Hoisted once per batch (perf review item 1): feat_unfold folded into W1 and
    # pre-applied to the latent; only this (B, H, N) slab is streamed, in bf16.
    featU = feat_unfold(latent)                                     # (B, N, 3D)
    ptot = jnp.einsum('bnc,ch->bhn', featU, w1f)                    # (B, H, N) f32
    ptot = ptot.astype(jnp.bfloat16)                                # halve HBM bytes

    vecs = jnp.concatenate(
        [jnp.transpose(w1c), jnp.transpose(b1), jnp.transpose(b2)],
        axis=1).astype(jnp.float32)                                 # (H, 3) packed
    w2_t = jnp.transpose(w2).astype(jnp.bfloat16)                   # (H, H)
    w3_row = w3t.astype(jnp.bfloat16)                               # (1, H)
    b3_s = b3.astype(jnp.float32)                                   # (1, 1) -> SMEM

    nq = qp // tq
    const_map = lambda b, qi: (0, 0)

    in_specs = [
        pl.BlockSpec((1, 1, tq), lambda b, qi: (b, 0, qi)),   # coord (lane-dense)
        pl.BlockSpec((1, H, N), lambda b, qi: (b, 0, 0)),     # Ptot, resident per batch
        pl.BlockSpec((H, 3), const_map),                      # packed [w1_rel | b1 | b2]
        pl.BlockSpec((H, H), const_map),                      # w2^T (bf16)
        pl.BlockSpec((1, H), const_map),                      # w3 row (bf16)
        pl.BlockSpec(memory_space=pltpu.MemorySpace.SMEM),    # b3 scalar in SMEM
    ]
    out_specs = pl.BlockSpec((1, 1, tq), lambda b, qi: (b, 0, qi))

    out = pl.pallas_call(
        lisa_query_kernel,
        out_shape=jax.ShapeDtypeStruct((B, 1, qp), jnp.float32),
        grid_spec=pltpu.PrefetchScalarGridSpec(
            num_scalar_prefetch=0,
            grid=(B, nq),
            in_specs=in_specs,
            out_specs=out_specs,
        ),
        compiler_params=pltpu.CompilerParams(
            dimension_semantics=("parallel", "parallel")),
    )(c, ptot, vecs, w2_t, w3_row, b3_s)

    return out.reshape(B, qp)[:, :Q][..., None]


def lisa_query_rgb_ref(coord, latent, params):
    """Pure-JAX f32 reference of LISA.query_rgb (eval path)."""
    w1c, w1f, b1, w2, b2, w3t, b3 = params
    B, Q, _ = coord.shape
    N = latent.shape[1]
    featU = feat_unfold(latent)
    feat_coord = -1.0 + (2.0 * jnp.arange(N, dtype=jnp.float32) + 1.0) / N
    rx = 1.0 / N
    c0 = coord[..., 0]                                   # (B, Q)
    preds, areas = [], []
    for vx in (-2.0, 0.0):
        c = jnp.clip(c0 + (vx * rx + 1e-6), -1.0 + 1e-6, 1.0 - 1e-6)
        idx = jnp.searchsorted(feat_coord, c.reshape(-1)).reshape(B, Q)
        idx = jnp.minimum(idx, N - 1)
        q_coord = feat_coord[idx]                        # (B, Q)
        q_feat = jnp.take_along_axis(featU, idx[:, :, None], axis=1)   # (B, Q, 3D)
        rel = (c0 - q_coord) * N                         # (B, Q)
        h = rel[..., None] * w1c + q_feat @ w1f + b1
        h = jnp.maximum(h, 0.0)
        h = h @ w2 + b2
        h = jnp.maximum(h, 0.0)
        pred = jnp.sum(h * w3t, axis=-1) + b3[0, 0]      # (B, Q)
        preds.append(pred)
        areas.append(jnp.abs(rel) + 1e-9)
    tot = areas[0] + areas[1]
    ret = preds[0] * (areas[1] / tot) + preds[1] * (areas[0] / tot)
    return ret[..., None]


def lisa_query_rgb_ref_bf16(coord, latent, params):
    """Pure-JAX reference with the same bf16 cast points as the kernel."""
    w1c, w1f, b1, w2, b2, w3t, b3 = params
    B, Q, _ = coord.shape
    N = latent.shape[1]
    featU = feat_unfold(latent)
    ptot = jnp.einsum('bnc,ch->bhn', featU, w1f).astype(jnp.bfloat16)     # as in wrapper
    ptot = jnp.transpose(ptot.astype(jnp.float32), (0, 2, 1))             # (B, N, H)
    w2b = w2.astype(jnp.bfloat16).astype(jnp.float32)
    w3b = w3t.astype(jnp.bfloat16).astype(jnp.float32)
    feat_coord = -1.0 + (2.0 * jnp.arange(N, dtype=jnp.float32) + 1.0) / N
    rx = 1.0 / N
    c0 = coord[..., 0]
    preds, areas = [], []
    for vx in (-2.0, 0.0):
        c = jnp.clip(c0 + (vx * rx + 1e-6), -1.0 + 1e-6, 1.0 - 1e-6)
        idx = jnp.searchsorted(feat_coord, c.reshape(-1)).reshape(B, Q)
        idx = jnp.minimum(idx, N - 1)
        q_coord = feat_coord[idx]
        q_p = jnp.take_along_axis(ptot, idx[:, :, None], axis=1)          # (B, Q, H)
        rel = (c0 - q_coord) * N
        h = rel[..., None] * w1c + q_p + b1
        h = jnp.maximum(h, 0.0)
        h = h.astype(jnp.bfloat16).astype(jnp.float32) @ w2b + b2
        h = jnp.maximum(h, 0.0)
        hb = h.astype(jnp.bfloat16).astype(jnp.float32)
        pred = jnp.sum(hb * w3b, axis=-1) + b3[0, 0]
        preds.append(pred)
        areas.append(jnp.abs(rel) + 1e-9)
    tot = areas[0] + areas[1]
    ret = preds[0] * (areas[1] / tot) + preds[1] * (areas[0] / tot)
    return ret[..., None]


def init_imnet_params(key, latent_dim, hidden):
    in_dim = 1 + 3 * latent_dim
    ks = jax.random.split(key, 6)
    w1 = jax.random.normal(ks[0], (in_dim, hidden), jnp.float32) / jnp.sqrt(float(in_dim))
    b1 = jax.random.normal(ks[1], (1, hidden), jnp.float32) * 0.01
    w2 = jax.random.normal(ks[2], (hidden, hidden), jnp.float32) / jnp.sqrt(float(hidden))
    b2 = jax.random.normal(ks[3], (1, hidden), jnp.float32) * 0.01
    w3t = jax.random.normal(ks[4], (1, hidden), jnp.float32) / jnp.sqrt(float(hidden))
    b3 = jax.random.normal(ks[5], (1, 1), jnp.float32) * 0.01
    w1c = w1[:1, :]     # first input row corresponds to rel_coord
    w1f = w1[1:, :]     # remaining rows correspond to the unfolded feature [prev|ctr|next]
    return (w1c, w1f, b1, w2, b2, w3t, b3)


if __name__ == "__main__":
    # batch, queries, num_latents, latent_dim, imnet hidden, query tile
    B, Q, N, D, H, TQ = 2, 640, 16, 16, 32, 512

    key = jax.random.PRNGKey(0)
    kc, kl, kw = jax.random.split(key, 3)

    # model_input['coord'] analog: (B, Q, 2); LISAGON.forward slices channel 1:2
    coord_full = jax.random.uniform(kc, (B, Q, 2), minval=-1.0, maxval=1.0,
                                    dtype=jnp.float32)
    coord = coord_full[:, :, 1:2]                       # (B, Q, 1)

    # latent stands in for the GON encoder output (B, num_latent, latent_dim)
    latent = jax.random.normal(kl, (B, N, D), dtype=jnp.float32)

    params = init_imnet_params(kw, D, H)

    out = lisa_query_rgb_pallas(coord, latent, params, tq=TQ)
    out = jax.block_until_ready(out)
    assert out.shape == (B, Q, 1), out.shape
    assert bool(jnp.all(jnp.isfinite(out)))

    # bf16-matched reference (same cast points): tight check on kernel semantics.
    ref_bf = lisa_query_rgb_ref_bf16(coord, latent, params)
    err_bf = float(jnp.max(jnp.abs(out - ref_bf)))
    assert err_bf < 3e-2, f"mismatch vs bf16-matched reference: max_err={err_bf}"

    # full-f32 reference: looser tolerance accounts for bf16 MXU inputs + approx recip.
    ref_32 = lisa_query_rgb_ref(coord, latent, params)
    err_32 = float(jnp.max(jnp.abs(out - ref_32)))
    assert err_32 < 8e-2, f"mismatch vs f32 reference: max_err={err_32}"

    print("KERNEL_OK")
</pallas_src>

<mosaic_0001>
module attributes {stable_mosaic.version = 11 : i64} {
  func.func @lisa_query_kernel(%arg0: i32, %arg1: i32, %arg2: memref<1x1x512xf32, #tpu.memory_space<vmem>>, %arg3: memref<1x32x16xbf16, #tpu.memory_space<vmem>>, %arg4: memref<32x3xf32, #tpu.memory_space<vmem>>, %arg5: memref<32x32xbf16, #tpu.memory_space<vmem>>, %arg6: memref<1x32xbf16, #tpu.memory_space<vmem>>, %arg7: memref<1x1xf32, #tpu.memory_space<smem>>, %arg8: memref<1x1x512xf32, #tpu.memory_space<vmem>>) attributes {dimension_semantics = [#tpu.dimension_semantics<parallel>, #tpu.dimension_semantics<parallel>], iteration_bounds = array<i64: 2, 2>, scalar_prefetch = 0 : i64, scratch_operands = 0 : i64, tpu.core_type = #tpu.core_type<tc>, window_params = [{transform_indices = @transform_0, window_bounds = array<i64: 1, 1, 512>}, {transform_indices = @transform_1, window_bounds = array<i64: 1, 32, 16>}, {pipeline_mode = #tpu.pipeline_mode<synchronous>, transform_indices = @transform_2, window_bounds = array<i64: 32, 3>}, {pipeline_mode = #tpu.pipeline_mode<synchronous>, transform_indices = @transform_3, window_bounds = array<i64: 32, 32>}, {pipeline_mode = #tpu.pipeline_mode<synchronous>, transform_indices = @transform_4, window_bounds = array<i64: 1, 32>}, {transform_indices = @transform_5, window_bounds = array<i64: 1, 1>}, {transform_indices = @transform_6, window_bounds = array<i64: 1, 1, 512>}]} {
    %c0 = arith.constant 0 : index
    %c0_0 = arith.constant 0 : index
    %c0_1 = arith.constant 0 : index
    %0 = vector.load %arg2[%c0, %c0_0, %c0_1] : memref<1x1x512xf32, #tpu.memory_space<vmem>>, vector<1x1x512xf32>
    %1 = vector.shape_cast %0 : vector<1x1x512xf32> to vector<1x512xf32>
    %c0_2 = arith.constant 0 : index
    %c0_3 = arith.constant 0 : index
    %c0_4 = arith.constant 0 : index
    %2 = vector.load %arg3[%c0_2, %c0_3, %c0_4] : memref<1x32x16xbf16, #tpu.memory_space<vmem>>, vector<1x32x16xbf16>
    %3 = vector.shape_cast %2 : vector<1x32x16xbf16> to vector<32x16xbf16>
    %c0_5 = arith.constant 0 : index
    %c0_6 = arith.constant 0 : index
    %4 = vector.load %arg4[%c0_5, %c0_6] : memref<32x3xf32, #tpu.memory_space<vmem>>, vector<32x3xf32>
    %5 = vector.extract_strided_slice %4 {offsets = [0, 0], sizes = [32, 1], strides = [1, 1]} : vector<32x3xf32> to vector<32x1xf32>
    %6 = vector.extract_strided_slice %4 {offsets = [0, 1], sizes = [32, 1], strides = [1, 1]} : vector<32x3xf32> to vector<32x1xf32>
    %7 = vector.extract_strided_slice %4 {offsets = [0, 2], sizes = [32, 1], strides = [1, 1]} : vector<32x3xf32> to vector<32x1xf32>
    %cst = arith.constant -1.249990e-01 : f32
    %8 = vector.broadcast %cst : f32 to vector<1x512xf32>
    %9 = arith.addf %1, %8 : vector<1x512xf32>
    %cst_7 = arith.constant 9.99999997E-7 : f32
    %10 = vector.broadcast %cst_7 : f32 to vector<1x512xf32>
    %11 = arith.addf %1, %10 : vector<1x512xf32>
    %12 = tpu.concatenate %9, %11 in 1 : vector<1x512xf32>, vector<1x512xf32> -> vector<1x1024xf32>
    %cst_8 = arith.constant -0.999998986 : f32
    %cst_9 = arith.constant 0.999998986 : f32
    %13 = vector.broadcast %cst_8 : f32 to vector<1x1024xf32>
    %14 = arith.maximumf %13, %12 : vector<1x1024xf32>
    %15 = vector.broadcast %cst_9 : f32 to vector<1x1024xf32>
    %16 = arith.minimumf %15, %14 : vector<1x1024xf32>
    %17 = tpu.concatenate %1, %1 in 1 : vector<1x512xf32>, vector<1x512xf32> -> vector<1x1024xf32>
    %cst_10 = arith.constant 1.000000e+00 : f32
    %18 = vector.broadcast %cst_10 : f32 to vector<1x1024xf32>
    %19 = arith.addf %16, %18 : vector<1x1024xf32>
    %cst_11 = arith.constant 8.000000e+00 : f32
    %20 = vector.broadcast %cst_11 : f32 to vector<1x1024xf32>
    %21 = arith.mulf %19, %20 : vector<1x1024xf32>
    %cst_12 = arith.constant 5.000000e-01 : f32
    %22 = vector.broadcast %cst_12 : f32 to vector<1x1024xf32>
    %23 = arith.subf %21, %22 : vector<1x1024xf32>
    %24 = math.ceil %23 : vector<1x1024xf32>
    %cst_13 = arith.constant 0.000000e+00 : f32
    %cst_14 = arith.constant 1.500000e+01 : f32
    %25 = vector.broadcast %cst_13 : f32 to vector<1x1024xf32>
    %26 = arith.maximumf %25, %24 : vector<1x1024xf32>
    %27 = vector.broadcast %cst_14 : f32 to vector<1x1024xf32>
    %28 = arith.minimumf %27, %26 : vector<1x1024xf32>
    %29 = arith.fptosi %28 : vector<1x1024xf32> to vector<1x1024xi32>
    %30 = arith.sitofp %29 : vector<1x1024xi32> to vector<1x1024xf32>
    %cst_15 = arith.constant 2.000000e+00 : f32
    %31 = vector.broadcast %cst_15 : f32 to vector<1x1024xf32>
    %32 = arith.mulf %31, %30 : vector<1x1024xf32>
    %cst_16 = arith.constant 1.000000e+00 : f32
    %33 = vector.broadcast %cst_16 : f32 to vector<1x1024xf32>
    %34 = arith.addf %32, %33 : vector<1x1024xf32>
    %cst_17 = arith.constant 1.600000e+01 : f32
    %35 = vector.broadcast %cst_17 : f32 to vector<1x1024xf32>
    %36 = arith.divf %34, %35 : vector<1x1024xf32>
    %cst_18 = arith.constant 1.000000e+00 : f32
    %37 = vector.broadcast %cst_18 : f32 to vector<1x1024xf32>
    %38 = arith.subf %36, %37 : vector<1x1024xf32>
    %39 = arith.cmpf olt, %38, %16 : vector<1x1024xf32>
    %c15_i32 = arith.constant 15 : i32
    %40 = vector.broadcast %c15_i32 : i32 to vector<1x1024xi32>
    %41 = arith.cmpi slt, %29, %40 : vector<1x1024xi32>
    %42 = arith.andi %39, %41 : vector<1x1024xi1>
    %c1_i32 = arith.constant 1 : i32
    %43 = vector.broadcast %c1_i32 : i32 to vector<1x1024xi32>
    %44 = arith.subi %29, %43 : vector<1x1024xi32>
    %45 = arith.sitofp %44 : vector<1x1024xi32> to vector<1x1024xf32>
    %cst_19 = arith.constant 2.000000e+00 : f32
    %46 = vector.broadcast %cst_19 : f32 to vector<1x1024xf32>
    %47 = arith.mulf %46, %45 : vector<1x1024xf32>
    %cst_20 = arith.constant 1.000000e+00 : f32
    %48 = vector.broadcast %cst_20 : f32 to vector<1x1024xf32>
    %49 = arith.addf %47, %48 : vector<1x1024xf32>
    %cst_21 = arith.constant 1.600000e+01 : f32
    %50 = vector.broadcast %cst_21 : f32 to vector<1x1024xf32>
    %51 = arith.divf %49, %50 : vector<1x1024xf32>
    %cst_22 = arith.constant 1.000000e+00 : f32
    %52 = vector.broadcast %cst_22 : f32 to vector<1x1024xf32>
    %53 = arith.subf %51, %52 : vector<1x1024xf32>
    %54 = arith.cmpf oge, %53, %16 : vector<1x1024xf32>
    %c0_i32 = arith.constant 0 : i32
    %55 = vector.broadcast %c0_i32 : i32 to vector<1x1024xi32>
    %56 = arith.cmpi sgt, %29, %55 : vector<1x1024xi32>
    %57 = arith.andi %54, %56 : vector<1x1024xi1>
    %58 = arith.extui %42 : vector<1x1024xi1> to vector<1x1024xi32>
    %59 = arith.addi %29, %58 : vector<1x1024xi32>
    %60 = arith.extui %57 : vector<1x1024xi1> to vector<1x1024xi32>
    %61 = arith.subi %59, %60 : vector<1x1024xi32>
    %62 = arith.sitofp %61 : vector<1x1024xi32> to vector<1x1024xf32>
    %cst_23 = arith.constant 2.000000e+00 : f32
    %63 = vector.broadcast %cst_23 : f32 to vector<1x1024xf32>
    %64 = arith.mulf %63, %62 : vector<1x1024xf32>
    %cst_24 = arith.constant 1.000000e+00 : f32
    %65 = vector.broadcast %cst_24 : f32 to vector<1x1024xf32>
    %66 = arith.addf %64, %65 : vector<1x1024xf32>
    %cst_25 = arith.constant 1.600000e+01 : f32
    %67 = vector.broadcast %cst_25 : f32 to vector<1x1024xf32>
    %68 = arith.divf %66, %67 : vector<1x1024xf32>
    %cst_26 = arith.constant 1.000000e+00 : f32
    %69 = vector.broadcast %cst_26 : f32 to vector<1x1024xf32>
    %70 = arith.subf %68, %69 : vector<1x1024xf32>
    %71 = arith.subf %17, %70 : vector<1x1024xf32>
    %cst_27 = arith.constant 1.600000e+01 : f32
    %72 = vector.broadcast %cst_27 : f32 to vector<1x1024xf32>
    %73 = arith.mulf %71, %72 : vector<1x1024xf32>
    %74 = tpu.iota {dimensions = array<i32: 0>} : vector<16x1024xi32>
    %75 = vector.broadcast %61 : vector<1x1024xi32> to vector<16x1024xi32>
    %76 = arith.cmpi eq, %74, %75 : vector<16x1024xi32>
    %77 = arith.extui %76 : vector<16x1024xi1> to vector<16x1024xi32>
    %78 = arith.sitofp %77 : vector<16x1024xi32> to vector<16x1024xf32>
    %79 = arith.truncf %78 : vector<16x1024xf32> to vector<16x1024xbf16>
    %cst_28 = arith.constant dense<0.000000e+00> : vector<32x1024xf32>
    %80 = tpu.matmul %3, %79, %cst_28 {dimension_numbers = #tpu.dot_dimension_numbers<[1], [0], [0], [1], [0, 0, 1, 1], [], []>} : vector<32x16xbf16>, vector<16x1024xbf16>, vector<32x1024xf32> -> vector<32x1024xf32>
    %81 = vector.broadcast %5 : vector<32x1xf32> to vector<32x1024xf32>
    %82 = vector.broadcast %73 : vector<1x1024xf32> to vector<32x1024xf32>
    %83 = arith.mulf %81, %82 : vector<32x1024xf32>
    %84 = arith.addf %80, %83 : vector<32x1024xf32>
    %85 = vector.broadcast %6 : vector<32x1xf32> to vector<32x1024xf32>
    %86 = arith.addf %84, %85 : vector<32x1024xf32>
    %cst_29 = arith.constant 0.000000e+00 : f32
    %87 = vector.broadcast %cst_29 : f32 to vector<32x1024xf32>
    %88 = arith.maximumf %86, %87 : vector<32x1024xf32>
    %c0_30 = arith.constant 0 : index
    %c0_31 = arith.constant 0 : index
    %89 = vector.load %arg5[%c0_30, %c0_31] : memref<32x32xbf16, #tpu.memory_space<vmem>>, vector<32x32xbf16>
    %90 = arith.truncf %88 : vector<32x1024xf32> to vector<32x1024xbf16>
    %cst_32 = arith.constant dense<0.000000e+00> : vector<32x1024xf32>
    %91 = tpu.matmul %89, %90, %cst_32 {dimension_numbers = #tpu.dot_dimension_numbers<[1], [0], [0], [1], [0, 0, 1, 1], [], []>} : vector<32x32xbf16>, vector<32x1024xbf16>, vector<32x1024xf32> -> vector<32x1024xf32>
    %92 = vector.broadcast %7 : vector<32x1xf32> to vector<32x1024xf32>
    %93 = arith.addf %91, %92 : vector<32x1024xf32>
    %cst_33 = arith.constant 0.000000e+00 : f32
    %94 = vector.broadcast %cst_33 : f32 to vector<32x1024xf32>
    %95 = arith.maximumf %93, %94 : vector<32x1024xf32>
    %c0_34 = arith.constant 0 : index
    %c0_35 = arith.constant 0 : index
    %96 = vector.load %arg6[%c0_34, %c0_35] : memref<1x32xbf16, #tpu.memory_space<vmem>>, vector<1x32xbf16>
    %97 = arith.truncf %95 : vector<32x1024xf32> to vector<32x1024xbf16>
    %cst_36 = arith.constant dense<0.000000e+00> : vector<1x1024xf32>
    %98 = tpu.matmul %96, %97, %cst_36 {dimension_numbers = #tpu.dot_dimension_numbers<[1], [0], [0], [1], [0, 0, 1, 1], [], []>} : vector<1x32xbf16>, vector<32x1024xbf16>, vector<1x1024xf32> -> vector<1x1024xf32>
    %c0_37 = arith.constant 0 : index
    %c0_38 = arith.constant 0 : index
    %99 = memref.load %arg7[%c0_37, %c0_38] : memref<1x1xf32, #tpu.memory_space<smem>>
    %100 = vector.broadcast %99 : f32 to vector<1x1024xf32>
    %101 = arith.addf %98, %100 : vector<1x1024xf32>
    %102 = vector.extract_strided_slice %101 {offsets = [0, 0], sizes = [1, 512], strides = [1, 1]} : vector<1x1024xf32> to vector<1x512xf32>
    %103 = vector.extract_strided_slice %101 {offsets = [0, 512], sizes = [1, 512], strides = [1, 1]} : vector<1x1024xf32> to vector<1x512xf32>
    %104 = vector.extract_strided_slice %73 {offsets = [0, 0], sizes = [1, 512], strides = [1, 1]} : vector<1x1024xf32> to vector<1x512xf32>
    %105 = vector.extract_strided_slice %73 {offsets = [0, 512], sizes = [1, 512], strides = [1, 1]} : vector<1x1024xf32> to vector<1x512xf32>
    %106 = math.absf %104 : vector<1x512xf32>
    %cst_39 = arith.constant 9.99999971E-10 : f32
    %107 = vector.broadcast %cst_39 : f32 to vector<1x512xf32>
    %108 = arith.addf %106, %107 : vector<1x512xf32>
    %109 = math.absf %105 : vector<1x512xf32>
    %cst_40 = arith.constant 9.99999971E-10 : f32
    %110 = vector.broadcast %cst_40 : f32 to vector<1x512xf32>
    %111 = arith.addf %109, %110 : vector<1x512xf32>
    %112 = arith.addf %108, %111 : vector<1x512xf32>
    %113 = tpu.reciprocal %112 {approx = true} : vector<1x512xf32> -> vector<1x512xf32>
    %114 = arith.mulf %111, %113 : vector<1x512xf32>
    %115 = arith.mulf %102, %114 : vector<1x512xf32>
    %116 = arith.mulf %108, %113 : vector<1x512xf32>
    %117 = arith.mulf %103, %116 : vector<1x512xf32>
    %118 = arith.addf %115, %117 : vector<1x512xf32>
    %c0_41 = arith.constant 0 : index
    %c0_42 = arith.constant 0 : index
    %c0_43 = arith.constant 0 : index
    %119 = vector.load %arg8[%c0_41, %c0_42, %c0_43] : memref<1x1x512xf32, #tpu.memory_space<vmem>>, vector<1x1x512xf32>
    %120 = vector.shape_cast %119 : vector<1x1x512xf32> to vector<1x512xf32>
    %121 = vector.shape_cast %118 : vector<1x512xf32> to vector<1x1x512xf32>
    tpu.vector_store %arg8[%c0_41, %c0_42, %c0_43], %121 {strides = array<i32>} : memref<1x1x512xf32, #tpu.memory_space<vmem>>, vector<1x1x512xf32>,
    return
  }
  func.func @transform_0(%arg0: i32, %arg1: i32) -> (i32, i32, i32) {
    %c0_i32 = arith.constant 0 : i32
    %c0_i32_0 = arith.constant 0 : i32
    return %arg0, %c0_i32, %arg1 : i32, i32, i32
  }
  func.func @transform_1(%arg0: i32, %arg1: i32) -> (i32, i32, i32) {
    %c0_i32 = arith.constant 0 : i32
    %c0_i32_0 = arith.constant 0 : i32
    %c0_i32_1 = arith.constant 0 : i32
    return %arg0, %c0_i32, %c0_i32_0 : i32, i32, i32
  }
  func.func @transform_2(%arg0: i32, %arg1: i32) -> (i32, i32) {
    %c0_i32 = arith.constant 0 : i32
    %c0_i32_0 = arith.constant 0 : i32
    %c0_i32_1 = arith.constant 0 : i32
    return %c0_i32, %c0_i32_0 : i32, i32
  }
  func.func @transform_3(%arg0: i32, %arg1: i32) -> (i32, i32) {
    %c0_i32 = arith.constant 0 : i32
    %c0_i32_0 = arith.constant 0 : i32
    %c0_i32_1 = arith.constant 0 : i32
    return %c0_i32, %c0_i32_0 : i32, i32
  }
  func.func @transform_4(%arg0: i32, %arg1: i32) -> (i32, i32) {
    %c0_i32 = arith.constant 0 : i32
    %c0_i32_0 = arith.constant 0 : i32
    %c0_i32_1 = arith.constant 0 : i32
    return %c0_i32, %c0_i32_0 : i32, i32
  }
  func.func @transform_5(%arg0: i32, %arg1: i32) -> (i32, i32) {
    %c0_i32 = arith.constant 0 : i32
    %c0_i32_0 = arith.constant 0 : i32
    %c0_i32_1 = arith.constant 0 : i32
    return %c0_i32, %c0_i32_0 : i32, i32
  }
  func.func @transform_6(%arg0: i32, %arg1: i32) -> (i32, i32, i32) {
    %c0_i32 = arith.constant 0 : i32
    %c0_i32_0 = arith.constant 0 : i32
    return %arg0, %c0_i32, %arg1 : i32, i32, i32
  }
}

</mosaic_0001>

<bundles_post_ra>
// kernel: tpu_custom_call.1
= control target key start
LH: loop header
LB: loop body
LE: loop exit
PB: predicated region body
PF: predicated region fallthrough
CT: control target
= control target key end

     0   :  { %s2666_s0 = inlined_call_operand.vmem [shape: f32[2,1,1024], index: 0, kind: input, shape index: {}]   ;;  %s2667_s1 = inlined_call_operand.vmem [shape: bf16[2,32,16], index: 1, kind: input, shape index: {}]   ;;  %s2668_s2 = inlined_call_operand.vmem [shape: f32[32,3], index: 2, kind: input, shape index: {}]   ;;  %s2669_s3 = inlined_call_operand.vmem [shape: bf16[32,32], index: 3, kind: input, shape index: {}]   ;;  %s2670_s4 = inlined_call_operand.vmem [shape: bf16[1,32], index: 4, kind: input, shape index: {}]   ;;  %s2671_s5 = inlined_call_operand.<no memory space> [shape: f32[1,1], index: 5, kind: input, shape index: {}]   ;;  %s2672_s6 = inlined_call_operand.hbm [shape: f32[2,1,1024], index: 6, kind: output, shape index: {}]  }
   0x1   :  { %11 = sst [smem:[#allocation2]] %s2671_s5 }
   0x2   :  { %12 = vsyncpa [#allocation4], 0 }
   0x3   :  { %14 = vsyncpa [#allocation4 + $0x1], 0  ;;  %s1953_s23 = smov 0   ;;  %s1955_s24 = smov 0  }
   0x4   :  { %s1957_s25 = smov 0   ;;  %s1959_s26 = smov 0  }
   0x5   :  { %s1961_s27 = smov 0   ;;  %s1963_s28 = smov 0  }
   0x6   :  { %s1965_s29 = smov 0   ;;  %s1967_s30 = smov 0  }
   0x7 LB: > { %s1548_s5 = sadd.s32 4294967295, %s1908_s30   ;;  %s1549_s7 = sadd.s32 4294967294, %s1908_s30   ;;  %s1908_s30 = sphi %s1967_s30, %s20_s30   ;;  %s1904_s29 = sphi %s1965_s29, %s2683_s29   ;;  %s1900_s28 = sphi %s1963_s28, %s2682_s28   ;;  %s1896_s27 = sphi %s1961_s27, %s2681_s27   ;;  %s1892_s26 = sphi %s1959_s26, %s2680_s26   ;;  %s1888_s25 = sphi %s1957_s25, %s2679_s25   ;;  %s1884_s24 = sphi %s1955_s24, %s2678_s24   ;;  %s1880_s23 = sphi %s1953_s23, %s2677_s23  }
   0x8   : > { %s29_s8 = sadd.s32 1, %s1900_s28  ;;  %s32_s9 = sadd.s32 1, %s1904_s29 }
   0x9   : > { %p30_p0 = scmp.ge.s32.totalorder %s29_s8, 2  ;;  %p189_p1 = scmp.ne.s32.totalorder %s1888_s25, %s1884_s24 }
   0xa   : > { %p190_p2 = scmp.eq.s32.totalorder %s1548_s5, 3  ;;  %p195_p5 = scmp.ne.s32.totalorder %s1884_s24, %s1880_s23 }
   0xb   : > { %s2685_s8 = smov (%p30_p0, %s29_s8), 0  ;;  %s2687_s9 = smov (!%p30_p0, %s32_s9), %s1904_s29 }
   0xc   : > { %s175_s10 = ssub.s32 %s1900_s28, %s2685_s8  ;;  %p2004_p3 = por %p190_p2, %p189_p1 }
   0xd   : > { %p34_p4 = scmp.ge.s32.totalorder %s2687_s9, 2  ;;  %p196_p6 = scmp.eq.s32.totalorder %s1549_s7, 3 }
   0xe   : > { %p1552_p7 = scmp.ge.s32.totalorder %s1908_s30, 1  ;;  %p246_p9 = scmp.lt.s32.totalorder %s1908_s30, 5 }
   0xf   : > { %s2689_s9 = smov (%p34_p4, %s2687_s9), 0  ;;  %p2013_p8 = por %p196_p6, %p195_p5 }
  0x10   : > { %s174_s13 = ssub.s32 %s1904_s29, %s2689_s9  ;;  %s179_s14 = sadd.s32 1, %s1888_s25 }
  0x11   : > { %s176_s15 = sor.u32 %s175_s10, %s174_s13  ;;  %p247_p10 = pnand %p1552_p7, %p246_p9 }
  0x12   : > { %p177_p11 = scmp.eq.s32.totalorder %s176_s15, 0  ;;  %s2025_s17 = sshll.u32 (!%p247_p10), %s1892_s26, 2 }
  0x13   : > { %250 = sbr.rel (%p247_p10) target bundleno = 601 (0x259), region = 44  ;;  %p285_p12 = scmp.lt.s32.totalorder (!%p247_p10), %s1896_s27, 1 }
  0x14   : > { %s2022_s16 = scalar_select %p177_p11, %s1888_s25, %s179_s14  }
  0x15   : > { %p287_p13 = scmp.lt.s32.totalorder (!%p247_p10), %s2025_s17, 7 }
  0x18   : > { %v1910_v0 = vmov 16.0   ;;  %s2030_s18 = scalar_select %p285_p12, %s1896_s27, 1  ;;  %v1911_v5 = vmov 0   ;;  %v641_v19 = vlaneseq }
  0x19   : > { %1804 = vrcp.f32 %v1910_v0  ;;  %s288_s19 = scalar_select %p287_p13, %s2025_s17, 7  ;;  %1796 = vset.pattern.permute.xlu0 %v1911_v5  ;;  %1797 = vset.pattern.permute.xlu1 %v1911_v5 }
  0x1a   : > { %s1555_s20 = sshll.u32 %s2030_s18, 3  ;;  %v2056_v29 = vshrl.u32 %v641_v19, 7 }
  0x1b   : > { %s290_s21 = sadd.s32 %s1555_s20, %s288_s19  ;;  %s1699_s20 = sshll.u32 %s2030_s18, 4 }
  0x1c   : > { %s291_s7 = scalar_lea.vmem %s2666_s0, %s290_s21  ;;  %v2076_v58 = vadd.s32 8, %v2056_v29  ;;  %s2166_s22 = scalar_lea.vmem %s2667_s1, %s1699_s20 }
  0x1d   : > { %v2037_v2 = vld [vmem:[%s291_s7] sm:$0xf]  ;;  %s1271_s20 = sld [smem:[#allocation2]]  ;;  %s281_s18 = sand.u32 1, %s1884_s24  }
  0x1e   : > { %v309_v3 = vadd.f32 -0.124999, %v2037_v2  ;;  %v310_v27 = vadd.f32 1e-06, %v2037_v2  ;;  %s1696_s21 = sshll.u32 %s1896_s27, 3  ;;  %s1444_s14 = scalar_lea.sflag [#allocation4], %s281_s18 }
  0x1f   : > { %v1805_v1 = vpop.eup %1804  ;;  %s1455_s5 = sadd.s32 %s1696_s21, %s2025_s17 }
  0x20   : > { %v435_v4 = vmul.f32 16.0, %v1805_v1  ;;  %v312_v6 = vperm.slane %v309_v3, 0  ;;  %v313_v7 = vperm.slane %v309_v3, 1  ;;  %v314_v8 = vperm.slane %v309_v3, 2  ;;  %s1456_s27 = scalar_lea.hbm %s2672_s6, %s1455_s5 }
  0x21   : > { %v315_v10 = vperm.slane %v309_v3, 3  ;;  %vm439_vm0 = vweird.f32 %v1805_v1  ;;  %v323_v34 = vperm.slane %v310_v27, 2  ;;  %v324_v35 = vperm.slane %v310_v27, 3  ;;  %s1460_s13 = sshll.u32 %s1456_s27, 4  ;;  %s1461_s13 = int_to_ptr.hbm [resolvable:$true] %s1460_s13 }
  0x22   : > { %v436_v9 = vsub.f32 1.0, %v435_v4  ;;  %v2042_v11 = vclamps-f32 %v312_v6, 0.999999  ;;  %v2044_v12 = vclamps-f32 %v313_v7, 0.999999  ;;  %v321_v38 = vperm.slane %v310_v27, 0 }
  0x23   : > { %v2046_v13 = vclamps-f32 %v314_v8, 0.999999  ;;  %v2048_v14 = vclamps-f32 %v315_v10, 0.999999  ;;  %v322_v39 = vperm.slane %v310_v27, 1  ;;  %s1828_s15 = sshra.s32 %s1461_s13, 4  ;;  %s1829_s15 = int_to_ptr.hbm [resolvable:$true] %s1828_s15 }
  0x24   : > { %v354_v15 = vadd.f32 1.0, %v2042_v11  ;;  %v355_v16 = vadd.f32 1.0, %v2044_v12  ;;  %v437_v18 = vmul.f32 %v1805_v1, %v436_v9  ;;  %v2058_v42 = vclamps-f32 %v323_v34, 0.999999  ;;  %s1830_s19 = scalar_lea.hbm %s1829_s15, 4  ;;  %p1835_p4 = scmp.lt.s32.totalorder %s1829_s15, %s2672_s6 }
  0x25   : > { %v356_v17 = vadd.f32 1.0, %v2046_v13  ;;  %v357_v20 = vadd.f32 1.0, %v2048_v14  ;;  %v2060_v43 = vclamps-f32 %v324_v35, 0.999999  ;;  %v2062_v46 = vclamps-f32 %v321_v38, 0.999999  ;;  %p1831_p0 = scmp.ne.s32.totalorder %s1829_s15, %s1830_s19 }
  0x26   : > { %v362_v21 = vmul.f32 8.0, %v354_v15  ;;  %v363_v22 = vmul.f32 8.0, %v355_v16  ;;  %v438_v28 = vadd.f32 %v1805_v1, %v437_v18  ;;  %v2064_v47 = vclamps-f32 %v322_v39, 0.999999  ;;  %v2105_v18 = vld [vmem:[%s2668_s2 + $0x10] sm:$0xff] }
  0x27   : > { %v364_v23 = vmul.f32 8.0, %v356_v17  ;;  %v365_v24 = vmul.f32 8.0, %v357_v20  ;;  %v360_v50 = vadd.f32 1.0, %v2058_v42  ;;  %v361_v51 = vadd.f32 1.0, %v2060_v43  ;;  %v2110_v20 = vld [vmem:[%s2668_s2] sm:$0xff]  ;;  %720 = vperm.xlu0 %1796, %v2105_v18   ;;  %p1832_p1 = pnand %p1831_p0, %p2004_p3 }
  0x28   : > { %v1566_v25 = vadd.f32 -0.5, %v362_v21  ;;  %v1567_v26 = vadd.f32 -0.5, %v363_v22  ;;  %v358_v54 = vadd.f32 1.0, %v2062_v46  ;;  %v359_v55 = vadd.f32 1.0, %v2064_v47  ;;  %710 = vperm.xlu1 %1797, %v2110_v20  }
  0x29   : > { %v1568_v30 = vadd.f32 -0.5, %v364_v23  ;;  %v1569_v31 = vadd.f32 -0.5, %v365_v24  ;;  %v2073_v57 = vsel %vm439_vm0, %v1805_v1, %v438_v28  ;;  %v2082_v61 = vmul.f32 8.0, %v360_v50  ;;  %p1833_p2 = pneg %p1832_p1 }
  0x2a   : > { %v378_v32 = vceil.f32 %v1566_v25  ;;  %v379_v33 = vceil.f32 %v1567_v26  ;;  %v2084_v62 = vmul.f32 8.0, %v361_v51  ;;  %v2090_v4 = vmul.f32 8.0, %v358_v54 }
  0x2b   : > { %v380_v36 = vceil.f32 %v1568_v30  ;;  %v381_v37 = vceil.f32 %v1569_v31  ;;  %v2095_v7 = vmul.f32 8.0, %v359_v55 }
  0x2c   : > { %v386_v40 = vmax.f32 %v378_v32, 0.0  ;;  %v387_v41 = vmax.f32 %v379_v33, 0.0 }
  0x2d   : > { %v388_v44 = vmax.f32 %v380_v36, 0.0  ;;  %v389_v45 = vmax.f32 %v381_v37, 0.0 }
  0x2e   : > { %v394_v48 = vmin.f32 %v386_v40, 15.0  ;;  %v395_v49 = vmin.f32 %v387_v41, 15.0 }
  0x2f   : > { %v396_v52 = vmin.f32 %v388_v44, 15.0  ;;  %v397_v53 = vmin.f32 %v389_v45, 15.0 }
  0x30   : > { %v2070_v56 = vcvt.f32.s32 %v394_v48  ;;  %v2078_v59 = vcvt.f32.s32 %v395_v49  ;;  %v2127_v49 = vld [vmem:[%s2668_s2 + $0x18] sm:$0xff] }
  0x31   : > { %v2080_v60 = vcvt.f32.s32 %v396_v52  ;;  %v2088_v3 = vcvt.f32.s32 %v397_v53  ;;  %725 = vperm.xlu0 %1796, %v2127_v49  }
  0x32   : > { %v410_v63 = vcvt.s32.f32 %v2070_v56  ;;  %v1582_v0 = vadd.s32 4294967295, %v2070_v56  ;;  %vm465_vm1 = vcmp.lt.s32.totalorder %v2070_v56, 15  ;;  %v411_v1 = vcvt.s32.f32 %v2078_v59 }
  0x33   : > { %v1583_v6 = vadd.s32 4294967295, %v2078_v59  ;;  %vm537_vm2 = vcmp.gt.s32.totalorder %v2070_v56, 0  ;;  %vm466_vm3 = vcmp.lt.s32.totalorder %v2078_v59, 15  ;;  %v412_v10 = vcvt.s32.f32 %v2080_v60 }
  0x34   : > { %v418_v8 = vmul.f32 2.0, %v410_v63  ;;  %v489_v9 = vcvt.s32.f32 %v1582_v0  ;;  %v419_v15 = vmul.f32 2.0, %v411_v1  ;;  %vm538_vm4 = vcmp.gt.s32.totalorder %v2078_v59, 0 }
  0x35   : > { %v490_v16 = vcvt.s32.f32 %v1583_v6  ;;  %v1584_v17 = vadd.s32 4294967295, %v2080_v60  ;;  %v420_v23 = vmul.f32 2.0, %v412_v10  ;;  %vm467_vm5 = vcmp.lt.s32.totalorder %v2080_v60, 15 }
  0x36   : > { %v426_v21 = vadd.f32 1.0, %v418_v8  ;;  %v497_v22 = vmul.f32 2.0, %v489_v9  ;;  %v413_v24 = vcvt.s32.f32 %v2088_v3  ;;  %v427_v25 = vadd.f32 1.0, %v419_v15 }
  0x37   : > { %v498_v26 = vmul.f32 2.0, %v490_v16  ;;  %v491_v27 = vcvt.s32.f32 %v1584_v17  ;;  %vm539_vm6 = vcmp.gt.s32.totalorder %v2080_v60, 0  ;;  %v428_v31 = vadd.f32 1.0, %v420_v23 }
  0x38   : > { %v441_v28 = vmul.f32 %v2073_v57, %v426_v21  ;;  %v505_v30 = vadd.f32 1.0, %v497_v22  ;;  %v421_v32 = vmul.f32 2.0, %v413_v24  ;;  %vm468_vm7 = vcmp.lt.s32.totalorder %v2088_v3, 15 }
  0x39   : > { %v442_v33 = vmul.f32 %v2073_v57, %v427_v25  ;;  %v506_v34 = vadd.f32 1.0, %v498_v26  ;;  %v499_v35 = vmul.f32 2.0, %v491_v27  ;;  %v1585_v36 = vadd.s32 4294967295, %v2088_v3  ;;  %v2178_v27 = vld [vmem:[%s2668_s2 + $0x8] sm:$0xff] }
  0x3a   : > { %v1574_v37 = vadd.f32 -1.0, %v441_v28  ;;  %v513_v38 = vmul.f32 %v505_v30, %v2073_v57  ;;  %v443_v39 = vmul.f32 %v2073_v57, %v428_v31  ;;  %v429_v40 = vadd.f32 1.0, %v421_v32  ;;  %715 = vperm.xlu1 %1797, %v2178_v27   ;;  %v2187_v31 = vld [vmem:[%s2166_s22] sm:$0xff] }
  0x3b   : > { %v1575_v41 = vadd.f32 -1.0, %v442_v33  ;;  %v514_v44 = vmul.f32 %v506_v34, %v2073_v57  ;;  %v507_v45 = vadd.f32 1.0, %v499_v35  ;;  %v492_v48 = vcvt.s32.f32 %v1585_v36 }
  0x3c   : > { %vm457_vm8 = vcmp.lt.f32.partialorder %v1574_v37, %v2042_v11  ;;  %v1590_v50 = vadd.f32 -1.0, %v513_v38  ;;  %v1576_v51 = vadd.f32 -1.0, %v443_v39  ;;  %v444_v52 = vmul.f32 %v2073_v57, %v429_v40 }
  0x3d   : > { %vm473_vm9 = vmand %vm457_vm8, %vm465_vm1  ;;  %vm458_vm10 = vcmp.lt.f32.partialorder %v1575_v41, %v2044_v12  ;;  %v1591_v53 = vadd.f32 -1.0, %v514_v44  ;;  %v515_v54 = vmul.f32 %v507_v45, %v2073_v57  ;;  %v500_v55 = vmul.f32 2.0, %v492_v48 }
  0x3e   : > { %vm529_vm11 = vcmp.ge.f32.partialorder %v1590_v50, %v2042_v11  ;;  %v553_v63 = vsel %vm473_vm9, 1, %v1911_v5  ;;  %vm474_vm12 = vmand %vm458_vm10, %vm466_vm3  ;;  %vm459_vm13 = vcmp.lt.f32.partialorder %v1576_v51, %v2046_v13  ;;  %v1577_v0 = vadd.f32 -1.0, %v444_v52 }
  0x3f   : > { %vm545_vm14 = vmand %vm529_vm11, %vm537_vm2  ;;  %v561_v1 = vadd.s32 %v2070_v56, %v553_v63  ;;  %vm530_vm15 = vcmp.ge.f32.partialorder %v1591_v53, %v2044_v12  ;;  %v554_v6 = vsel %vm474_vm12, 1, %v1911_v5  ;;  %v1592_v11 = vadd.f32 -1.0, %v515_v54 }
  0x40   : > { %v569_v8 = vsel %vm545_vm14, 1, %v1911_v5  ;;  %vm546_vm0 = vmand %vm530_vm15, %vm538_vm4  ;;  %v562_v9 = vadd.s32 %v2078_v59, %v554_v6  ;;  %vm460_vm1 = vcmp.lt.f32.partialorder %v1577_v0, %v2048_v14  ;;  %v508_v10 = vadd.f32 1.0, %v500_v55 }
  0x41   : > { %v577_v15 = vsub.s32 %v561_v1, %v569_v8  ;;  %v570_v16 = vsel %vm546_vm0, 1, %v1911_v5  ;;  %vm475_vm2 = vmand %vm459_vm13, %vm467_vm5  ;;  %vm531_vm3 = vcmp.ge.f32.partialorder %v1592_v11, %v2046_v13  ;;  %vm540_vm8 = vcmp.gt.s32.totalorder %v2088_v3, 0 }
  0x42   : > { %v578_v12 = vsub.s32 %v562_v9, %v570_v16  ;;  %vm547_vm4 = vmand %vm531_vm3, %vm539_vm6  ;;  %v555_v56 = vsel %vm475_vm2, 1, %v1911_v5  ;;  %v516_v59 = vmul.f32 %v508_v10, %v2073_v57  ;;  %vm778_vm9 = vcmask 130048  }
  0x43   : > { %v585_v17 = vcvt.s32.f32 %v577_v15  ;;  %v644_v21 = vperm.slane %v577_v15, 0  ;;  %v563_v13 = vadd.s32 %v2080_v60, %v555_v56  ;;  %v571_v22 = vsel %vm547_vm4, 1, %v1911_v5  ;;  %vm476_vm5 = vmand %vm460_vm1, %vm468_vm7 }
  0x44   : > { %v586_v23 = vcvt.s32.f32 %v578_v12  ;;  %v645_v24 = vperm.slane %v578_v12, 0  ;;  %v1593_v25 = vadd.f32 -1.0, %v516_v59  ;;  %v556_v26 = vsel %vm476_vm5, 1, %v1911_v5 }
  0x45   : > { %v593_v28 = vmul.f32 2.0, %v585_v17  ;;  %vm652_vm6 = vcmp.eq.s32.totalorder %v2056_v29, %v644_v21  ;;  %vm660_vm10 = vcmp.eq.s32.totalorder %v2076_v58, %v644_v21  ;;  %v579_v60 = vsub.s32 %v563_v13, %v571_v22 }
  0x46   : > { %vm1630_vm7 = vmpackc.low %vm660_vm10, %vm652_vm6  ;;  %v594_v30 = vmul.f32 2.0, %v586_v23  ;;  %vm653_vm11 = vcmp.eq.s32.totalorder %v2056_v29, %v645_v24  ;;  %vm661_vm12 = vcmp.eq.s32.totalorder %v2076_v58, %v645_v24  ;;  %vm532_vm13 = vcmp.ge.f32.partialorder %v1593_v25, %v2048_v14 }
  0x47   : > { %v601_v32 = vadd.f32 1.0, %v593_v28  ;;  %v1912_v33 = vmov 1.0|1.0   ;;  %vm1634_vm14 = vmpackc.low %vm661_vm12, %vm653_vm11  ;;  %v587_v34 = vcvt.s32.f32 %v579_v60  ;;  %v646_v35 = vperm.slane %v579_v60, 0 }
  0x48   : > { %1631 = vmatpush.bf16.msk.msra.mxu0 %vm1630_vm7, %v1912_v33  ;;  %v564_v36 = vadd.s32 %v2088_v3, %v556_v26  ;;  %v602_v37 = vadd.f32 1.0, %v594_v30  ;;  %1635 = vmatpush.bf16.msk.msra.mxu1 %vm1634_vm14, %v1912_v33  ;;  %vm548_vm15 = vmand %vm532_vm13, %vm540_vm8  ;;  %v1572_v38 = vadd.f32 -0.5, %v2082_v61  ;;  %v1573_v14 = vadd.f32 -0.5, %v2084_v62  ;;  %v2238_v26 = vld [vmem:[%s2166_s22 + $0x8] sm:$0xff]  ;;  %s1553_s22 = sshll.u32 %s281_s18, 2 }
  0x49   : > { %v2197_v39 = vmul.f32 %v601_v32, %v2073_v57  ;;  %v595_v40 = vmul.f32 2.0, %v587_v34  ;;  %vm654_vm0 = vcmp.eq.s32.totalorder %v2056_v29, %v646_v35  ;;  %vm662_vm1 = vcmp.eq.s32.totalorder %v2076_v58, %v646_v35  ;;  %s283_s10 = scalar_lea.vmem [#allocation3], %s1553_s22  ;;  %s1834_s22 = scalar_lea.hbm %s2672_s6, 16 }
  0x4a   : > { %v1913_v41 = vmov 1   ;;  %v2202_v44 = vmul.f32 %v602_v37, %v2073_v57  ;;  %vm1638_vm2 = vmpackc.low %vm662_vm1, %vm654_vm0  ;;  %v572_v3 = vsel %vm548_vm15, 1, %v1911_v5  ;;  %v384_v61 = vceil.f32 %v1572_v38  ;;  %s1458_s17 = sshll.u32 %s283_s10, 4  ;;  %p1836_p5 = scmp.lt.s32.totalorder %s1834_s22, %s1830_s19  ;;  %s1459_s17 = int_to_ptr.vmem [resolvable:$true] %s1458_s17 }
  0x4b   : > { %1799 = vset.pattern.permute.xlu0 %v1913_v41  ;;  %1798 = vset.pattern.permute.xlu2 %v1913_v41  ;;  %v385_v62 = vceil.f32 %v1573_v14  ;;  %v603_v45 = vadd.f32 1.0, %v595_v40  ;;  %v580_v48 = vsub.s32 %v564_v36, %v572_v3  ;;  %v1570_v50 = vadd.f32 -0.5, %v2090_v4 }
  0x4c   : > { %1632 = vmatmul.msk.bf16.vlgmr.msra.gmra.mxu0 %vm778_vm9, %v2187_v31  ;;  %938 = vperm.xlu0 %1799, %v2110_v20   ;;  %v392_v51 = vmax.f32 %v384_v61, 0.0  ;;  %v1571_v53 = vadd.f32 -0.5, %v2095_v7  ;;  %p1837_p6 = por %p1836_p5, %p1835_p4 }
  0x4d   : > { %1639 = vmatpush.bf16.msk.msra.mxu2 %vm1638_vm2, %v1912_v33  ;;  %1636 = vmatmul.msk.bf16.vlgmr.msra.gmra.mxu1 %vm778_vm9, %v2187_v31  ;;  %v393_v52 = vmax.f32 %v385_v62, 0.0  ;;  %v2215_v54 = vmul.f32 %v603_v45, %v2073_v57  ;;  %v588_v55 = vcvt.s32.f32 %v580_v48  ;;  %v647_v63 = vperm.slane %v580_v48, 0 }
  0x4e   : > { %946 = vperm.xlu2 %1798, %v2105_v18   ;;  %1800 = vset.pattern.permute.xlu1 %v1913_v41  ;;  %v382_v0 = vceil.f32 %v1570_v50  ;;  %v400_v1 = vmin.f32 %v392_v51, 15.0  ;;  %v383_v4 = vceil.f32 %v1571_v53  ;;  %p1838_p7 = pnand %p1837_p6, %p1833_p2 }
  0x4f   : > { %v401_v6 = vmin.f32 %v393_v52, 15.0  ;;  %942 = vperm.xlu1 %1800, %v2178_v27   ;;  %v596_v11 = vmul.f32 2.0, %v588_v55  ;;  %vm655_vm3 = vcmp.eq.s32.totalorder %v2056_v29, %v647_v63  ;;  %vm663_vm8 = vcmp.eq.s32.totalorder %v2076_v58, %v647_v63 }
  0x50   : > { %1640 = vmatmul.msk.bf16.vlgmr.msra.gmra.mxu2 %vm778_vm9, %v2187_v31  ;;  %vm1642_vm4 = vmpackc.low %vm663_vm8, %vm655_vm3  ;;  %v2222_v7 = vcvt.f32.s32 %v400_v1  ;;  %v390_v9 = vmax.f32 %v382_v0, 0.0  ;;  %v391_v15 = vmax.f32 %v383_v4, 0.0 }
  0x51   : > { %v2224_v8 = vcvt.f32.s32 %v401_v6  ;;  %v604_v10 = vadd.f32 1.0, %v596_v11  ;;  %1643 = vmatpush.bf16.msk.msra.mxu3 %vm1642_vm4, %v1912_v33 }
  0x52   : > { %v416_v16 = vcvt.s32.f32 %v2222_v7  ;;  %v1588_v12 = vadd.s32 4294967295, %v2222_v7  ;;  %v398_v22 = vmin.f32 %v390_v9, 15.0  ;;  %v399_v25 = vmin.f32 %v391_v15, 15.0 }
  0x53   : > { %v2230_v56 = vmul.f32 %v604_v10, %v2073_v57  ;;  %v417_v59 = vcvt.s32.f32 %v2224_v8  ;;  %v1589_v17 = vadd.s32 4294967295, %v2224_v8  ;;  %vm471_vm5 = vcmp.lt.s32.totalorder %v2222_v7, 15 }
  0x54   : > { %1644 = vmatmul.msk.bf16.vlgmr.msra.gmra.mxu3 %vm778_vm9, %v2187_v31  ;;  %v424_v21 = vmul.f32 2.0, %v416_v16  ;;  %v495_v13 = vcvt.s32.f32 %v1588_v12  ;;  %v2241_v30 = vcvt.f32.s32 %v398_v22  ;;  %vm543_vm6 = vcmp.gt.s32.totalorder %v2222_v7, 0 }
  0x55   : > { %v425_v23 = vmul.f32 2.0, %v417_v59  ;;  %v496_v24 = vcvt.s32.f32 %v1589_v17  ;;  %v2244_v35 = vcvt.f32.s32 %v399_v25  ;;  %vm472_vm10 = vcmp.lt.s32.totalorder %v2224_v8, 15 }
  0x56   : > { %950 = vperm.xlu2 %1798, %v2127_v49   ;;  %v432_v28 = vadd.f32 1.0, %v424_v21  ;;  %v503_v60 = vmul.f32 2.0, %v495_v13  ;;  %v414_v38 = vcvt.s32.f32 %v2241_v30  ;;  %vm544_vm7 = vcmp.gt.s32.totalorder %v2224_v8, 0 }
  0x57   : > { %v433_v32 = vadd.f32 1.0, %v425_v23  ;;  %v504_v34 = vmul.f32 2.0, %v496_v24  ;;  %v1586_v41 = vadd.s32 4294967295, %v2241_v30  ;;  %v415_v45 = vcvt.s32.f32 %v2244_v35 }
  0x58   : > { %v447_v36 = vmul.f32 %v2073_v57, %v432_v28  ;;  %v511_v37 = vadd.f32 1.0, %v503_v60  ;;  %v422_v62 = vmul.f32 2.0, %v414_v38  ;;  %vm469_vm11 = vcmp.lt.s32.totalorder %v2241_v30, 15 }
  0x59   : > { %v448_v14 = vmul.f32 %v2073_v57, %v433_v32  ;;  %v512_v40 = vadd.f32 1.0, %v504_v34  ;;  %v493_v51 = vcvt.s32.f32 %v1586_v41  ;;  %v423_v55 = vmul.f32 2.0, %v415_v45 }
  0x5a   : > { %v1580_v3 = vadd.f32 -1.0, %v447_v36  ;;  %v519_v61 = vmul.f32 %v511_v37, %v2073_v57  ;;  %v430_v53 = vadd.f32 1.0, %v422_v62  ;;  %vm541_vm15 = vcmp.gt.s32.totalorder %v2241_v30, 0 }
  0x5b   : > { %v1581_v48 = vadd.f32 -1.0, %v448_v14  ;;  %v520_v50 = vmul.f32 %v512_v40, %v2073_v57  ;;  %v501_v0 = vmul.f32 2.0, %v493_v51  ;;  %v1587_v1 = vadd.s32 4294967295, %v2244_v35 }
  0x5c   : > { %1633 = vmatmul.msk.bf16.gmra.mxu0 %vm778_vm9, %v2238_v26  ;;  %vm463_vm12 = vcmp.lt.f32.partialorder %v1580_v3, %v2058_v42  ;;  %v1596_v52 = vadd.f32 -1.0, %v519_v61  ;;  %v445_v4 = vmul.f32 %v2073_v57, %v430_v53  ;;  %v431_v11 = vadd.f32 1.0, %v423_v55 }
  0x5d   : > { %1637 = vmatmul.msk.bf16.gmra.mxu1 %vm778_vm9, %v2238_v26  ;;  %vm479_vm13 = vmand %vm463_vm12, %vm471_vm5  ;;  %vm464_vm14 = vcmp.lt.f32.partialorder %v1581_v48, %v2060_v43  ;;  %v1597_v63 = vadd.f32 -1.0, %v520_v50  ;;  %v509_v15 = vadd.f32 1.0, %v501_v0  ;;  %v494_v13 = vcvt.s32.f32 %v1587_v1 }
  0x5e   : > { %vm535_vm0 = vcmp.ge.f32.partialorder %v1596_v52, %v2058_v42  ;;  %v559_v6 = vsel %vm479_vm13, 1, %v1911_v5  ;;  %vm480_vm1 = vmand %vm464_vm14, %vm472_vm10  ;;  %v1578_v12 = vadd.f32 -1.0, %v445_v4  ;;  %v446_v59 = vmul.f32 %v2073_v57, %v431_v11 }
  0x5f   : > { %vm551_vm2 = vmand %vm535_vm0, %vm543_vm6  ;;  %v567_v9 = vadd.s32 %v2222_v7, %v559_v6  ;;  %vm536_vm3 = vcmp.ge.f32.partialorder %v1597_v63, %v2060_v43  ;;  %v560_v10 = vsel %vm480_vm1, 1, %v1911_v5  ;;  %v517_v7 = vmul.f32 %v509_v15, %v2073_v57 }
  0x60   : > { %1641 = vmatmul.msk.bf16.gmra.mxu2 %vm778_vm9, %v2238_v26  ;;  %v575_v42 = vsel %vm551_vm2, 1, %v1911_v5  ;;  %vm552_vm8 = vmand %vm536_vm3, %vm544_vm7  ;;  %v568_v16 = vadd.s32 %v2224_v8, %v560_v10  ;;  %vm461_vm4 = vcmp.lt.f32.partialorder %v1578_v12, %v2062_v46  ;;  %v1579_v22 = vadd.f32 -1.0, %v446_v59 }
  0x61   : > { %v583_v17 = vsub.s32 %v567_v9, %v575_v42  ;;  %v576_v21 = vsel %vm552_vm8, 1, %v1911_v5  ;;  %vm470_vm5 = vcmp.lt.s32.totalorder %v2244_v35, 15  ;;  %vm477_vm6 = vmand %vm461_vm4, %vm469_vm11  ;;  %v1594_v8 = vadd.f32 -1.0, %v517_v7 }
  0x62   : > { %v584_v43 = vsub.s32 %v568_v16, %v576_v21  ;;  %v502_v25 = vmul.f32 2.0, %v494_v13  ;;  %v557_v32 = vsel %vm477_vm6, 1, %v1911_v5  ;;  %vm462_vm10 = vcmp.lt.f32.partialorder %v1579_v22, %v2064_v47 }
  0x63   : > { %v591_v23 = vcvt.s32.f32 %v583_v17  ;;  %v650_v24 = vperm.slane %v583_v17, 0  ;;  %vm533_vm13 = vcmp.ge.f32.partialorder %v1594_v8, %v2062_v46  ;;  %vm2298_vm11 = vmand %vm462_vm10, %vm470_vm5  ;;  %v565_v38 = vadd.s32 %v2241_v30, %v557_v32 }
  0x64   : > { %1645 = vmatmul.msk.bf16.gmra.mxu3 %vm778_vm9, %v2238_v26  ;;  %v592_v28 = vcvt.s32.f32 %v584_v43  ;;  %v651_v60 = vperm.slane %v584_v43, 0  ;;  %v510_v40 = vadd.f32 1.0, %v502_v25  ;;  %vm549_vm3 = vmand %vm533_vm13, %vm541_vm15  ;;  %v558_v62 = vsel %vm2298_vm11, 1, %v1911_v5 }
  0x65   : > { %v599_v34 = vmul.f32 2.0, %v591_v23  ;;  %vm658_vm7 = vcmp.eq.s32.totalorder %v2056_v29, %v650_v24  ;;  %vm666_vm12 = vcmp.eq.s32.totalorder %v2076_v58, %v650_v24  ;;  %v573_v3 = vsel %vm549_vm3, 1, %v1911_v5 }
  0x66   : > { %vm1654_vm14 = vmpackc.low %vm666_vm12, %vm658_vm7  ;;  %v600_v37 = vmul.f32 2.0, %v592_v28  ;;  %vm659_vm0 = vcmp.eq.s32.totalorder %v2056_v29, %v651_v60  ;;  %vm667_vm1 = vcmp.eq.s32.totalorder %v2076_v58, %v651_v60  ;;  %v518_v61 = vmul.f32 %v510_v40, %v2073_v57 }
  0x67   : > { %v607_v14 = vadd.f32 1.0, %v599_v34  ;;  %1655 = vmatpush.bf16.msk.msrb.mxu2 %vm1654_vm14, %v1912_v33  ;;  %vm1658_vm2 = vmpackc.low %vm667_vm1, %vm659_vm0  ;;  %v581_v48 = vsub.s32 %v565_v38, %v573_v3  ;;  %vm542_vm8 = vcmp.gt.s32.totalorder %v2244_v35, 0  ;;  %v566_v52 = vadd.s32 %v2244_v35, %v558_v62 }
  0x68   : > { %v608_v46 = vadd.f32 1.0, %v600_v37  ;;  %1659 = vmatpush.bf16.msk.msrb.mxu3 %vm1658_vm2, %v1912_v33  ;;  %v1595_v50 = vadd.f32 -1.0, %v518_v61  ;;  %v347_v9 = vperm.slane %v2037_v2, 1  ;;  %v348_v7 = vperm.slane %v2037_v2, 2 }
  0x69   : > { %v2310_v41 = vmul.f32 %v607_v14, %v2073_v57  ;;  %v589_v30 = vcvt.s32.f32 %v581_v48  ;;  %v648_v51 = vperm.slane %v581_v48, 0  ;;  %v1601_v28 = vadd.f32 -1.0, %v2230_v56 }
  0x6a   : > { %v2318_v45 = vmul.f32 %v608_v46, %v2073_v57  ;;  %vm534_vm15 = vcmp.ge.f32.partialorder %v1595_v50, %v2064_v47  ;;  %v349_v60 = vperm.slane %v2037_v2, 3  ;;  %vm1431_vm11 = vcmask 1040384  }
  0x6b   : > { %v597_v53 = vmul.f32 2.0, %v589_v30  ;;  %vm656_vm4 = vcmp.eq.s32.totalorder %v2056_v29, %v648_v51  ;;  %vm664_vm5 = vcmp.eq.s32.totalorder %v2076_v58, %v648_v51  ;;  %vm550_vm6 = vmand %vm534_vm15, %vm542_vm8  ;;  %vm1433_vm14 = vcmask 1042434  }
  0x6c   : > { %vm1646_vm10 = vmpackc.low %vm664_vm5, %vm656_vm4  ;;  %v574_v55 = vsel %vm550_vm6, 1, %v1911_v5  ;;  %v628_v3 = vsub.f32 %v349_v60, %v1601_v28  ;;  %vm1435_vm0 = vcmask 1041408   ;;  %vm1440_vm1 = vcmp.lt.s32.totalorder %v641_v19, 512 }
  0x6d   : > { %v605_v63 = vadd.f32 1.0, %v597_v53  ;;  %1647 = vmatpush.bf16.msk.msrb.mxu0 %vm1646_vm10, %v1912_v33  ;;  %v582_v0 = vsub.s32 %v566_v52, %v574_v55 }
  0x6f   : > { %v2330_v35 = vmul.f32 %v605_v63, %v2073_v57  ;;  %v590_v47 = vcvt.s32.f32 %v582_v0  ;;  %v649_v1 = vperm.slane %v582_v0, 0 }
  0x70   : > { %1656 = vmatmul.msk.bf16.vlgmr.msrb.gmra.mxu2 %vm778_vm9, %v2187_v31  ;;  %1648 = vmatmul.msk.bf16.vlgmr.msrb.gmra.mxu0 %vm778_vm9, %v2187_v31 }
  0x71   : > { %v598_v6 = vmul.f32 2.0, %v590_v47  ;;  %vm657_vm7 = vcmp.eq.s32.totalorder %v2056_v29, %v649_v1  ;;  %vm665_vm12 = vcmp.eq.s32.totalorder %v2076_v58, %v649_v1  ;;  %v1598_v58 = vadd.f32 -1.0, %v2197_v39 }
  0x72   : > { %vm1650_vm13 = vmpackc.low %vm665_vm12, %vm657_vm7 }
  0x73   : > { %v606_v5 = vadd.f32 1.0, %v598_v6  ;;  %1651 = vmatpush.bf16.msk.msrb.mxu1 %vm1650_vm13, %v1912_v33 }
  0x74   : > { %1660 = vmatmul.msk.bf16.vlgmr.msrb.gmra.mxu3 %vm778_vm9, %v2187_v31 }
  0x75   : > { %v2340_v4 = vmul.f32 %v606_v5, %v2073_v57  ;;  %v346_v57 = vperm.slane %v2037_v2, 0  ;;  %v2404_v5 = vmul.f32 16.0, %v628_v3 }
  0x76   : > { %1652 = vmatmul.msk.bf16.vlgmr.msrb.gmra.mxu1 %vm778_vm9, %v2187_v31  ;;  %v1599_v31 = vadd.f32 -1.0, %v2202_v44  ;;  %v1600_v44 = vadd.f32 -1.0, %v2215_v54 }
  0x77   : > { %v625_v15 = vsub.f32 %v346_v57, %v1598_v58  ;;  %v731_v28 = vperm.slane %v2404_v5, 0 }
  0x78   : > { %v627_v8 = vsub.f32 %v348_v7, %v1600_v44 }
  0x79   : > { %v2364_v16 = vmul.f32 16.0, %v625_v15 }
  0x7a   : > { %v2392_v40 = vmul.f32 16.0, %v627_v8 }
  0x7b   : > { %v728_v21 = vperm.slane %v2364_v16, 0 }
  0x7c   : > { %v730_v63 = vperm.slane %v2392_v40, 0 }
  0x80   : > { %1657 = vmatmul.msk.bf16.gmra.mxu2 %vm778_vm9, %v2238_v26  ;;  %1649 = vmatmul.msk.bf16.gmra.mxu0 %vm778_vm9, %v2238_v26 }
  0x84   : > { %1661 = vmatmul.msk.bf16.gmra.mxu3 %vm778_vm9, %v2238_v26 }
  0x86   : > { %1653 = vmatmul.msk.bf16.gmra.mxu1 %vm778_vm9, %v2238_v26  ;;  %v626_v26 = vsub.f32 %v347_v9, %v1599_v31  ;;  %vm1063_vm9 = vcmask 261120  }
  0x88   : > { %v2368_v59 = vmul.f32 16.0, %v626_v26 }
  0x8a   : > { %v729_v22 = vperm.slane %v2368_v59, 0 }
  0x99   : > { %v2354_v11 = vpop.permute.xlu0 %720 }
  0x9a   : > { %v2358_v10 = vpop.permute.xlu1 %710  ;;  %v752_v54 = vmul.f32 %v728_v21, %v2354_v11  ;;  %v753_v34 = vmul.f32 %v729_v22, %v2354_v11  ;;  %v754_v15 = vmul.f32 %v730_v63, %v2354_v11 }
  0x9b   : > { %v736_v36 = vmul.f32 %v728_v21, %v2358_v10  ;;  %v737_v38 = vmul.f32 %v729_v22, %v2358_v10 }
  0xa3   : > { %v2371_v17 = vpop.permute.xlu0 %725 }
  0xa4   : > { %v760_v50 = vmul.f32 %v728_v21, %v2371_v17  ;;  %v761_v55 = vmul.f32 %v729_v22, %v2371_v17 }
  0xa8   : > { %v2377_v43 = vpop.permute.xlu2 %946 }
  0xac   : > { %v2375_v13 = vpop.permute.xlu1 %715 }
  0xad   : > { %v744_v37 = vmul.f32 %v728_v21, %v2375_v13  ;;  %v745_v14 = vmul.f32 %v729_v22, %v2375_v13 }
  0xb0   : > { %v2407_v31 = vpop.permute.xlu2 %950 }
  0xbe   : > { %v2396_v62 = vpop.permute.xlu0 %938 }
  0xc1   : > { %v2401_v0 = vpop.permute.xlu1 %942 }
  0xc9   : > { %v794_v29 = vpop.f32.mrf.mxu0 }
  0xca   : > { %v813_v33 = vpop.f32.mrf.mxu1  ;;  %v795_v61 = vadd.f32 %v794_v29, %v736_v36 }
  0xcb   : > { %v814_v30 = vadd.f32 %v813_v33, %v737_v38 }
  0xcd   : > { %v954_v21 = vadd.f32 %v2396_v62, %v814_v30  ;;  %v755_v30 = vmul.f32 %v731_v28, %v2354_v11 }
  0xd1   : > { %v796_v42 = vpop.f32.mrf.mxu0 }
  0xd2   : > { %v815_v39 = vpop.f32.mrf.mxu1  ;;  %v797_v48 = vadd.f32 %v796_v42, %v744_v37  ;;  %v953_v42 = vadd.f32 %v2396_v62, %v795_v61  ;;  %v986_v61 = vmax.f32 %v954_v21, 0.0 }
  0xd3   : > { %v2366_v12 = vpop.f32.mrf.mxu2  ;;  %v816_v51 = vadd.f32 %v815_v39, %v745_v14 }
  0xd4   : > { %v961_v39 = vadd.f32 %v2401_v0, %v797_v48  ;;  %v985_v14 = vmax.f32 %v953_v42, 0.0 }
  0xd5   : > { %v962_v22 = vadd.f32 %v2401_v0, %v816_v51  ;;  %v762_v51 = vmul.f32 %v730_v63, %v2371_v17 }
  0xd7   : > { %v2380_v23 = vpop.f32.mrf.mxu3  ;;  %v994_v48 = vmax.f32 %v962_v22, 0.0 }
  0xd9   : > { %v799_v24 = vpop.f32.mrf.mxu0 }
  0xda   : > { %v818_v25 = vpop.f32.mrf.mxu1  ;;  %v800_v46 = vadd.f32 %v799_v24, %v752_v54  ;;  %v746_v24 = vmul.f32 %v730_v63, %v2375_v13 }
  0xdb   : > { %v834_v32 = vpop.f32.mrf.mxu2  ;;  %v819_v56 = vadd.f32 %v818_v25, %v753_v34  ;;  %v738_v25 = vmul.f32 %v730_v63, %v2358_v10 }
  0xdc   : > { %v969_v47 = vadd.f32 %v2377_v43, %v800_v46  ;;  %v993_v46 = vmax.f32 %v961_v39, 0.0 }
  0xdd   : > { %v970_v29 = vadd.f32 %v2377_v43, %v819_v56 }
  0xde   : > { %v1001_v8 = vmax.f32 %v969_v47, 0.0  ;;  %v833_v47 = vadd.f32 %v2366_v12, %v738_v25  ;;  %v763_v12 = vmul.f32 %v731_v28, %v2371_v17 }
  0xdf   : > { %v853_v52 = vpop.f32.mrf.mxu3  ;;  %v1002_v34 = vmax.f32 %v970_v29, 0.0  ;;  %v1021_v29 = vpack.c.bf16 %v993_v46, %v985_v14  ;;  %v1602_v14 = vadd.f32 -1.0, %v2330_v35 }
  0xe0   : > { %v955_v21 = vadd.f32 %v2396_v62, %v833_v47 }
  0xe1   : > { %v801_v53 = vpop.f32.mrf.mxu0 }
  0xe2   : > { %v802_v1 = vadd.f32 %v801_v53, %v760_v50  ;;  %v820_v6 = vpop.f32.mrf.mxu1  ;;  %v835_v50 = vadd.f32 %v834_v32, %v746_v24  ;;  %v747_v53 = vmul.f32 %v731_v28, %v2375_v13  ;;  %v2428_v32 = vld [vmem:[%s2669_s3] sm:$0xff] }
  0xe3   : > { %v837_v58 = vpop.f32.mrf.mxu2  ;;  %v821_v33 = vadd.f32 %v820_v6, %v761_v55 }
  0xe4   : > { %v977_v26 = vadd.f32 %v2407_v31, %v802_v1  ;;  %v838_v37 = vadd.f32 %v837_v58, %v754_v15  ;;  %v739_v58 = vmul.f32 %v731_v28, %v2358_v10  ;;  %v854_v42 = vadd.f32 %v853_v52, %v747_v53 }
  0xe5   : > { %v978_v44 = vadd.f32 %v2407_v31, %v821_v33  ;;  %v1022_v33 = vpack.c.bf16 %v994_v48, %v986_v61  ;;  %v1603_v48 = vadd.f32 -1.0, %v2340_v4 }
  0xe6   : > { %v1009_v54 = vmax.f32 %v977_v26, 0.0  ;;  %v971_v1 = vadd.f32 %v2377_v43, %v838_v37  ;;  %v963_v26 = vadd.f32 %v2401_v0, %v835_v50  ;;  %v852_v22 = vadd.f32 %v2380_v23, %v739_v58 }
  0xe7   : > { %v1010_v36 = vmax.f32 %v978_v44, 0.0  ;;  %v856_v3 = vpop.f32.mrf.mxu3  ;;  %v987_v23 = vmax.f32 %v955_v21, 0.0  ;;  %v964_v37 = vadd.f32 %v2401_v0, %v854_v42  ;;  %v1605_v50 = vadd.f32 -1.0, %v2318_v45 }
  0xe8   : > { %v1029_v38 = vpack.c.bf16 %v1009_v54, %v1001_v8  ;;  %v857_v63 = vadd.f32 %v856_v3, %v755_v30  ;;  %v1003_v39 = vmax.f32 %v971_v1, 0.0  ;;  %v995_v52 = vmax.f32 %v963_v26, 0.0 }
  0xe9   : > { %v1030_v56 = vpack.c.bf16 %v1010_v36, %v1002_v34  ;;  %v956_v61 = vadd.f32 %v2396_v62, %v852_v22  ;;  %v996_v53 = vmax.f32 %v964_v37, 0.0  ;;  %v630_v4 = vsub.f32 %v347_v9, %v1603_v48 }
  0xea   : > { %1076 = vmatpush.bf16.msra.mxu0 %v1029_v38  ;;  %v972_v8 = vadd.f32 %v2377_v43, %v857_v63  ;;  %v1604_v38 = vadd.f32 -1.0, %v2310_v41 }
  0xeb   : > { %v839_v55 = vpop.f32.mrf.mxu2  ;;  %1095 = vmatpush.bf16.msra.mxu1 %v1030_v56  ;;  %v1023_v56 = vpack.c.bf16 %v995_v52, %v987_v23  ;;  %v988_v1 = vmax.f32 %v956_v61, 0.0  ;;  %v2476_v2 = vmul.f32 16.0, %v630_v4 }
  0xec   : > { %v840_v6 = vadd.f32 %v839_v55, %v762_v51  ;;  %v1004_v46 = vmax.f32 %v972_v8, 0.0  ;;  %v629_v55 = vsub.f32 %v346_v57, %v1602_v14  ;;  %v631_v35 = vsub.f32 %v348_v7, %v1604_v38  ;;  %v2470_v7 = vld [vmem:[%s2669_s3 + $0x8] sm:$0xff] }
  0xed   : > { %v2438_v34 = vpop.f32.mrf.mxu0  ;;  %v1914_v57 = vmov 2  }
  0xee   : > { %v979_v15 = vadd.f32 %v2407_v31, %v840_v6  ;;  %1077 = vmatpush.bf16.msra.mxu0 %v1021_v29  ;;  %v632_v6 = vsub.f32 %v349_v60, %v1605_v50  ;;  %v1024_v29 = vpack.c.bf16 %v996_v53, %v988_v1  ;;  %1803 = vset.pattern.permute.xlu0 %v1914_v57  ;;  %v2465_v58 = vmul.f32 16.0, %v629_v55 }
  0xef   : > { %1096 = vmatpush.bf16.msra.mxu1 %v1022_v33  ;;  %v858_v24 = vpop.f32.mrf.mxu3  ;;  %1802 = vset.pattern.permute.xlu1 %v1914_v57  ;;  %v2474_v9 = vmul.f32 16.0, %v631_v35 }
  0xf0   : > { %v1011_v44 = vmax.f32 %v979_v15, 0.0  ;;  %v859_v25 = vadd.f32 %v858_v24, %v763_v12  ;;  %1042 = vperm.xlu0 %1803, %v2178_v27   ;;  %1050 = vperm.xlu1 %1802, %v2127_v49   ;;  %v2479_v60 = vmul.f32 16.0, %v632_v6  ;;  %v732_v63 = vperm.slane %v2465_v58, 0 }
  0xf1   : > { %1670 = vmatmul.msk.bf16.vlgmr.msra.gmra.mxu0 %vm1063_vm9, %v2428_v32  ;;  %1801 = vset.pattern.permute.xlu2 %v1914_v57  ;;  %v734_v49 = vperm.slane %v2474_v9, 0 }
  0xf2   : > { %v1031_v54 = vpack.c.bf16 %v1011_v44, %v1003_v39  ;;  %1672 = vmatmul.msk.bf16.vlgmr.msra.gmra.mxu1 %vm1063_vm9, %v2428_v32  ;;  %v980_v36 = vadd.f32 %v2407_v31, %v859_v25  ;;  %1046 = vperm.xlu2 %1801, %v2105_v18   ;;  %v733_v18 = vperm.slane %v2476_v2, 0  ;;  %v735_v12 = vperm.slane %v2479_v60, 0 }
  0xf3   : > { %v2442_v28 = vpop.f32.mrf.mxu2  ;;  %v2451_v51 = vpop.f32.mrf.mxu1  ;;  %v756_v42 = vmul.f32 %v732_v63, %v2354_v11  ;;  %v758_v39 = vmul.f32 %v734_v49, %v2354_v11  ;;  %v740_v44 = vmul.f32 %v732_v63, %v2358_v10  ;;  %v748_v22 = vmul.f32 %v732_v63, %v2375_v13 }
  0xf4   : > { %1114 = vmatpush.bf16.msra.mxu2 %v1031_v54  ;;  %v1012_v3 = vmax.f32 %v980_v36, 0.0  ;;  %v741_v21 = vmul.f32 %v733_v18, %v2358_v10  ;;  %v742_v8 = vmul.f32 %v734_v49, %v2358_v10  ;;  %v743_v54 = vmul.f32 %v735_v12, %v2358_v10 }
  0xf5   : > { %v872_v47 = vpop.f32.mrf.mxu0  ;;  %v750_v25 = vmul.f32 %v734_v49, %v2375_v13  ;;  %v871_v23 = vadd.f32 %v2438_v34, %v740_v44  ;;  %v749_v38 = vmul.f32 %v733_v18, %v2375_v13  ;;  %v766_v10 = vmul.f32 %v734_v49, %v2371_v17 }
  0xf6   : > { %v1032_v30 = vpack.c.bf16 %v1012_v3, %v1004_v46  ;;  %v873_v37 = vadd.f32 %v872_v47, %v748_v22  ;;  %v764_v46 = vmul.f32 %v732_v63, %v2371_v17  ;;  %v909_v3 = vadd.f32 %v2442_v28, %v742_v8 }
  0xf7   : > { %v2455_v41 = vpop.f32.mrf.mxu3  ;;  %v757_v50 = vmul.f32 %v733_v18, %v2354_v11  ;;  %v759_v34 = vmul.f32 %v735_v12, %v2354_v11  ;;  %v765_v28 = vmul.f32 %v733_v18, %v2371_v17  ;;  %v957_v47 = vadd.f32 %v2396_v62, %v871_v23 }
  0xf8   : > { %1115 = vmatpush.bf16.msra.mxu2 %v1023_v56  ;;  %1133 = vmatpush.bf16.msra.mxu3 %v1032_v30  ;;  %v965_v1 = vadd.f32 %v2401_v0, %v873_v37  ;;  %v959_v11 = vadd.f32 %v2396_v62, %v909_v3  ;;  %v890_v63 = vadd.f32 %v2451_v51, %v741_v21 }
  0xfa   : > { %1038 = vperm.xlu2 %1801, %v2110_v20   ;;  %v751_v20 = vmul.f32 %v735_v12, %v2375_v13  ;;  %v767_v13 = vmul.f32 %v735_v12, %v2371_v17  ;;  %v928_v17 = vadd.f32 %v2455_v41, %v743_v54  ;;  %v997_v44 = vmax.f32 %v965_v1, 0.0 }
  0xfb   : > { %v910_v45 = vpop.f32.mrf.mxu2  ;;  %1674 = vmatmul.msk.bf16.vlgmr.msra.gmra.mxu2 %vm1063_vm9, %v2428_v32  ;;  %v891_v33 = vpop.f32.mrf.mxu1  ;;  %v991_v54 = vmax.f32 %v959_v11, 0.0 }
  0xfc   : > { %1134 = vmatpush.bf16.msra.mxu3 %v1024_v29  ;;  %v911_v56 = vadd.f32 %v910_v45, %v750_v25  ;;  %v892_v49 = vadd.f32 %v891_v33, %v749_v38  ;;  %v958_v38 = vadd.f32 %v2396_v62, %v890_v63 }
  0xfd   : > { %v875_v27 = vpop.f32.mrf.mxu0 }
  0xfe   : > { %v876_v24 = vadd.f32 %v875_v27, %v756_v42  ;;  %v967_v6 = vadd.f32 %v2401_v0, %v911_v56  ;;  %v966_v41 = vadd.f32 %v2401_v0, %v892_v49 }
  0xff   : > { %v929_v15 = vpop.f32.mrf.mxu3  ;;  %1676 = vmatmul.msk.bf16.vlgmr.msra.gmra.mxu3 %vm1063_vm9, %v2428_v32 }
 0x100   : > { %v973_v48 = vadd.f32 %v2377_v43, %v876_v24 }
 0x101   : > { %1671 = vmatmul.msk.bf16.gmra.mxu0 %vm1063_vm9, %v2470_v7 }
 0x102   : > { %1673 = vmatmul.msk.bf16.gmra.mxu1 %vm1063_vm9, %v2470_v7  ;;  %v1005_v27 = vmax.f32 %v973_v48, 0.0 }
 0x103   : > { %v913_v26 = vpop.f32.mrf.mxu2  ;;  %v894_v52 = vpop.f32.mrf.mxu1 }
 0x104   : > { %v914_v36 = vadd.f32 %v913_v26, %v758_v39  ;;  %v895_v4 = vadd.f32 %v894_v52, %v757_v50  ;;  %v930_v26 = vadd.f32 %v929_v15, %v751_v20  ;;  %v999_v52 = vmax.f32 %v967_v6, 0.0 }
 0x105   : > { %v877_v61 = vpop.f32.mrf.mxu0 }
 0x106   : > { %v878_v30 = vadd.f32 %v877_v61, %v764_v46  ;;  %v975_v55 = vadd.f32 %v2377_v43, %v914_v36  ;;  %v974_v22 = vadd.f32 %v2377_v43, %v895_v4  ;;  %v989_v36 = vmax.f32 %v957_v47, 0.0 }
 0x107   : > { %v932_v14 = vpop.f32.mrf.mxu3  ;;  %v968_v23 = vadd.f32 %v2401_v0, %v930_v26  ;;  %v1027_v61 = vpack.c.bf16 %v999_v52, %v991_v54  ;;  %v990_v0 = vmax.f32 %v958_v38, 0.0 }
 0x108   : > { %v981_v45 = vadd.f32 %v2407_v31, %v878_v30  ;;  %v933_v29 = vadd.f32 %v932_v14, %v759_v34  ;;  %v1007_v12 = vmax.f32 %v975_v55, 0.0  ;;  %v1006_v14 = vmax.f32 %v974_v22, 0.0 }
 0x109   : > { %v1025_v3 = vpack.c.bf16 %v997_v44, %v989_v36  ;;  %v1000_v50 = vmax.f32 %v968_v23, 0.0 }
 0x10a   : > { %v1013_v18 = vmax.f32 %v981_v45, 0.0  ;;  %v976_v51 = vadd.f32 %v2377_v43, %v933_v29  ;;  %v960_v43 = vadd.f32 %v2396_v62, %v928_v17 }
 0x10b   : > { %v915_v53 = vpop.f32.mrf.mxu2  ;;  %1675 = vmatmul.msk.bf16.gmra.mxu2 %vm1063_vm9, %v2470_v7  ;;  %v896_v42 = vpop.f32.mrf.mxu1 }
 0x10c   : > { %v916_v35 = vadd.f32 %v915_v53, %v766_v10  ;;  %v1033_v24 = vpack.c.bf16 %v1013_v18, %v1005_v27  ;;  %v897_v8 = vadd.f32 %v896_v42, %v765_v28  ;;  %v1008_v56 = vmax.f32 %v976_v51, 0.0 }
 0x10d   : > { %v998_v10 = vmax.f32 %v966_v41, 0.0 }
 0x10e   : > { %v983_v57 = vadd.f32 %v2407_v31, %v916_v35  ;;  %v982_v15 = vadd.f32 %v2407_v31, %v897_v8  ;;  %1152 = vmatpush.bf16.msrb.mxu0 %v1033_v24 }
 0x10f   : > { %v934_v25 = vpop.f32.mrf.mxu3  ;;  %1677 = vmatmul.msk.bf16.gmra.mxu3 %vm1063_vm9, %v2470_v7  ;;  %v1026_v30 = vpack.c.bf16 %v998_v10, %v990_v0 }
 0x110   : > { %v1015_v39 = vmax.f32 %v983_v57, 0.0  ;;  %v935_v21 = vadd.f32 %v934_v25, %v767_v13  ;;  %v1014_v46 = vmax.f32 %v982_v15, 0.0 }
 0x112   : > { %v1035_v33 = vpack.c.bf16 %v1015_v39, %v1007_v12  ;;  %v984_v37 = vadd.f32 %v2407_v31, %v935_v21  ;;  %v1034_v48 = vpack.c.bf16 %v1014_v46, %v1006_v14  ;;  %1153 = vmatpush.bf16.msrb.mxu0 %v1025_v3  ;;  %v992_v31 = vmax.f32 %v960_v43, 0.0 }
 0x114   : > { %1190 = vmatpush.bf16.msrb.mxu2 %v1035_v33  ;;  %v1016_v20 = vmax.f32 %v984_v37, 0.0  ;;  %1171 = vmatpush.bf16.msrb.mxu1 %v1034_v48  ;;  %v1028_v62 = vpack.c.bf16 %v1000_v50, %v992_v31  ;;  %v2567_v37 = vld [vmem:[%s2670_s4] sm:$0x1] }
 0x115   : > { %1678 = vmatmul.msk.bf16.vlgmr.msrb.gmra.mxu0 %vm1063_vm9, %v2428_v32 }
 0x116   : > { %v1036_v34 = vpack.c.bf16 %v1016_v20, %v1008_v56 }
 0x118   : > { %1191 = vmatpush.bf16.msrb.mxu2 %v1027_v61  ;;  %1209 = vmatpush.bf16.msrb.mxu3 %v1036_v34 }
 0x119   : > { %1172 = vmatpush.bf16.msrb.mxu1 %v1026_v30 }
 0x11b   : > { %1682 = vmatmul.msk.bf16.vlgmr.msrb.gmra.mxu2 %vm1063_vm9, %v2428_v32 }
 0x11c   : > { %1210 = vmatpush.bf16.msrb.mxu3 %v1028_v62  ;;  %1680 = vmatmul.msk.bf16.vlgmr.msrb.gmra.mxu1 %vm1063_vm9, %v2428_v32 }
 0x11f   : > { %1684 = vmatmul.msk.bf16.vlgmr.msrb.gmra.mxu3 %vm1063_vm9, %v2428_v32 }
 0x125   : > { %1679 = vmatmul.msk.bf16.gmra.mxu0 %vm1063_vm9, %v2470_v7 }
 0x12b   : > { %1683 = vmatmul.msk.bf16.gmra.mxu2 %vm1063_vm9, %v2470_v7 }
 0x12c   : > { %1681 = vmatmul.msk.bf16.gmra.mxu1 %vm1063_vm9, %v2470_v7 }
 0x12f   : > { %1685 = vmatmul.msk.bf16.gmra.mxu3 %vm1063_vm9, %v2470_v7 }
 0x14c   : > { %v2548_v13 = vpop.permute.xlu2 %1046 }
 0x154   : > { %v2554_v29 = vpop.permute.xlu2 %1038 }
 0x162   : > { %v2551_v11 = vpop.permute.xlu1 %1050  ;;  %v2556_v57 = vpop.permute.xlu0 %1042 }
 0x16e   : > { %v1079_v53 = vpop.f32.mrf.mxu0 }
 0x16f   : > { %v1098_v55 = vpop.f32.mrf.mxu1  ;;  %v1080_v17 = vadd.f32 %v1079_v53, %v2554_v29 }
 0x170   : > { %v1099_v39 = vadd.f32 %v1098_v55, %v2554_v29 }
 0x171   : > { %v1222_v25 = vmax.f32 %v1080_v17, 0.0 }
 0x172   : > { %v1223_v21 = vmax.f32 %v1099_v39, 0.0 }
 0x176   : > { %v1081_v28 = vpop.f32.mrf.mxu0 }
 0x177   : > { %v1100_v35 = vpop.f32.mrf.mxu1  ;;  %v1082_v26 = vadd.f32 %v1081_v28, %v2556_v57 }
 0x178   : > { %v1101_v44 = vadd.f32 %v1100_v35, %v2556_v57 }
 0x179   : > { %v1230_v52 = vmax.f32 %v1082_v26, 0.0 }
 0x17a   : > { %v1231_v36 = vmax.f32 %v1101_v44, 0.0 }
 0x17b   : > { %v1255_v15 = vpack.c.bf16 %v1230_v52, %v1222_v25 }
 0x17c   : > { %v1256_v54 = vpack.c.bf16 %v1231_v36, %v1223_v21 }
 0x17e   : > { %v1117_v47 = vpop.f32.mrf.mxu2  ;;  %v1084_v32 = vpop.f32.mrf.mxu0 }
 0x17f   : > { %v1103_v1 = vpop.f32.mrf.mxu1  ;;  %v1085_v4 = vadd.f32 %v1084_v32, %v2548_v13  ;;  %v1118_v61 = vadd.f32 %v1117_v47, %v2554_v29 }
 0x180   : > { %v1104_v6 = vadd.f32 %v1103_v1, %v2548_v13 }
 0x181   : > { %v1238_v18 = vmax.f32 %v1085_v4, 0.0  ;;  %v1224_v30 = vmax.f32 %v1118_v61, 0.0 }
 0x182   : > { %v1136_v45 = vpop.f32.mrf.mxu3  ;;  %v1239_v42 = vmax.f32 %v1104_v6, 0.0 }
 0x183   : > { %v1137_v1 = vadd.f32 %v1136_v45, %v2554_v29 }
 0x185   : > { %v1225_v6 = vmax.f32 %v1137_v1, 0.0 }
 0x186   : > { %v1119_v7 = vpop.f32.mrf.mxu2  ;;  %v1086_v63 = vpop.f32.mrf.mxu0 }
 0x187   : > { %v1105_v49 = vpop.f32.mrf.mxu1  ;;  %v1087_v27 = vadd.f32 %v1086_v63, %v2551_v11  ;;  %v1120_v43 = vadd.f32 %v1119_v7, %v2556_v57 }
 0x188   : > { %v1106_v12 = vadd.f32 %v1105_v49, %v2551_v11 }
 0x189   : > { %v1246_v22 = vmax.f32 %v1087_v27, 0.0  ;;  %v1232_v50 = vmax.f32 %v1120_v43, 0.0 }
 0x18a   : > { %v1247_v24 = vmax.f32 %v1106_v12, 0.0  ;;  %v1138_v51 = vpop.f32.mrf.mxu3 }
 0x18b   : > { %v1263_v8 = vpack.c.bf16 %v1246_v22, %v1238_v18  ;;  %v1139_v62 = vadd.f32 %v1138_v51, %v2556_v57  ;;  %v1257_v32 = vpack.c.bf16 %v1232_v50, %v1224_v30 }
 0x18c   : > { %v1264_v33 = vpack.c.bf16 %v1247_v24, %v1239_v42 }
 0x18d   : > { %1282 = vmatpush.bf16.msra.mxu0 %v1263_v8  ;;  %v1233_v4 = vmax.f32 %v1139_v62, 0.0 }
 0x18e   : > { %v1122_v41 = vpop.f32.mrf.mxu2  ;;  %1295 = vmatpush.bf16.msra.mxu1 %v1264_v33 }
 0x18f   : > { %v1123_v38 = vadd.f32 %v1122_v41, %v2548_v13  ;;  %v1258_v49 = vpack.c.bf16 %v1233_v4, %v1225_v6 }
 0x191   : > { %1283 = vmatpush.bf16.msra.mxu0 %v1255_v15  ;;  %v1240_v56 = vmax.f32 %v1123_v38, 0.0 }
 0x192   : > { %1296 = vmatpush.bf16.msra.mxu1 %v1256_v54  ;;  %v1141_v23 = vpop.f32.mrf.mxu3  ;;  %v1155_v46 = vpop.f32.mrf.mxu0 }
 0x193   : > { %v1142_v10 = vadd.f32 %v1141_v23, %v2548_v13  ;;  %v1156_v39 = vadd.f32 %v1155_v46, %v2554_v29 }
 0x194   : > { %1686 = vmatmul.msk.bf16.vlgmr.msra.gmra.mxu0 %vm1063_vm9, %v2567_v37 }
 0x195   : > { %1687 = vmatmul.msk.bf16.vlgmr.msra.gmra.mxu1 %vm1063_vm9, %v2567_v37  ;;  %v1241_v55 = vmax.f32 %v1142_v10, 0.0  ;;  %v1226_v25 = vmax.f32 %v1156_v39, 0.0  ;;  %v1390_v39 = vand.u32 2147483647, %v2474_v9 }
 0x196   : > { %v1124_v14 = vpop.f32.mrf.mxu2 }
 0x197   : > { %v1125_v3 = vadd.f32 %v1124_v14, %v2551_v11 }
 0x199   : > { %v1248_v20 = vmax.f32 %v1125_v3, 0.0  ;;  %v1174_v0 = vpop.f32.mrf.mxu1 }
 0x19a   : > { %v1143_v34 = vpop.f32.mrf.mxu3  ;;  %v1157_v35 = vpop.f32.mrf.mxu0  ;;  %v1175_v15 = vadd.f32 %v1174_v0, %v2554_v29 }
 0x19b   : > { %v1265_v48 = vpack.c.bf16 %v1248_v20, %v1240_v56  ;;  %v1144_v31 = vadd.f32 %v1143_v34, %v2551_v11  ;;  %v1158_v44 = vadd.f32 %v1157_v35, %v2556_v57 }
 0x19d   : > { %1308 = vmatpush.bf16.msra.mxu2 %v1265_v48  ;;  %v1249_v28 = vmax.f32 %v1144_v31, 0.0  ;;  %v1234_v52 = vmax.f32 %v1158_v44, 0.0  ;;  %v1227_v48 = vmax.f32 %v1175_v15, 0.0 }
 0x19e   : > { %v1193_v53 = vpop.f32.mrf.mxu2 }
 0x19f   : > { %v1266_v47 = vpack.c.bf16 %v1249_v28, %v1241_v55  ;;  %v1259_v3 = vpack.c.bf16 %v1234_v52, %v1226_v25  ;;  %v1194_v20 = vadd.f32 %v1193_v53, %v2554_v29  ;;  %v1394_v25 = vadd.f32 1e-09, %v1390_v39 }
 0x1a0   : > { %v1383_v52 = vand.u32 2147483647, %v2404_v5 }
 0x1a1   : > { %1309 = vmatpush.bf16.msra.mxu2 %v1257_v32  ;;  %1321 = vmatpush.bf16.msra.mxu3 %v1266_v47  ;;  %v1176_v63 = vpop.f32.mrf.mxu1  ;;  %v1228_v55 = vmax.f32 %v1194_v20, 0.0 }
 0x1a2   : > { %v1212_v7 = vpop.f32.mrf.mxu3  ;;  %v1160_v18 = vpop.f32.mrf.mxu0  ;;  %v1177_v54 = vadd.f32 %v1176_v63, %v2556_v57 }
 0x1a3   : > { %v1161_v45 = vadd.f32 %v1160_v18, %v2548_v13  ;;  %v1213_v32 = vadd.f32 %v1212_v7, %v2554_v29 }
 0x1a4   : > { %1688 = vmatmul.msk.bf16.vlgmr.msra.gmra.mxu2 %vm1063_vm9, %v2567_v37  ;;  %v1235_v50 = vmax.f32 %v1177_v54, 0.0  ;;  %v1272_v54 = vstv %s1271_s20 }
 0x1a5   : > { %1322 = vmatpush.bf16.msra.mxu3 %v1258_v49  ;;  %v1242_v24 = vmax.f32 %v1161_v45, 0.0  ;;  %v1229_v63 = vmax.f32 %v1213_v32, 0.0  ;;  %v1389_v45 = vand.u32 2147483647, %v2476_v2 }
 0x1a6   : > { %v1195_v27 = vpop.f32.mrf.mxu2  ;;  %v1260_v53 = vpack.c.bf16 %v1235_v50, %v1227_v48 }
 0x1a7   : > { %v1196_v14 = vadd.f32 %v1195_v27, %v2556_v57  ;;  %v1393_v44 = vadd.f32 1e-09, %v1389_v45 }
 0x1a8   : > { %1689 = vmatmul.msk.bf16.vlgmr.msra.gmra.mxu3 %vm1063_vm9, %v2567_v37 }
 0x1a9   : > { %v1179_v26 = vpop.f32.mrf.mxu1  ;;  %v1236_v0 = vmax.f32 %v1196_v14, 0.0 }
 0x1aa   : > { %v1214_v17 = vpop.f32.mrf.mxu3  ;;  %v1162_v42 = vpop.f32.mrf.mxu0  ;;  %v1180_v51 = vadd.f32 %v1179_v26, %v2548_v13 }
 0x1ab   : > { %v1163_v22 = vadd.f32 %v1162_v42, %v2551_v11  ;;  %v1215_v28 = vadd.f32 %v1214_v17, %v2556_v57  ;;  %v1261_v1 = vpack.c.bf16 %v1236_v0, %v1228_v55  ;;  %v1381_v17 = vand.u32 2147483647, %v2368_v59 }
 0x1ac   : > { %v1243_v43 = vmax.f32 %v1180_v51, 0.0  ;;  %v1391_v59 = vand.u32 2147483647, %v2479_v60 }
 0x1ad   : > { %v1250_v8 = vmax.f32 %v1163_v22, 0.0  ;;  %v1385_v42 = vadd.f32 1e-09, %v1381_v17  ;;  %v1380_v22 = vand.u32 2147483647, %v2364_v16 }
 0x1ae   : > { %v1198_v12 = vpop.f32.mrf.mxu2  ;;  %v1395_v9 = vadd.f32 1e-09, %v1391_v59 }
 0x1af   : > { %v1267_v33 = vpack.c.bf16 %v1250_v8, %v1242_v24  ;;  %v1199_v41 = vadd.f32 %v1198_v12, %v2548_v13  ;;  %v1382_v12 = vand.u32 2147483647, %v2392_v40  ;;  %v1397_v51 = vadd.f32 %v1393_v44, %v1385_v42 }
 0x1b1   : > { %v1181_v36 = vpop.f32.mrf.mxu1  ;;  %1334 = vmatpush.bf16.msrb.mxu0 %v1267_v33  ;;  %v1244_v61 = vmax.f32 %v1199_v41, 0.0  ;;  %v1386_v8 = vadd.f32 1e-09, %v1382_v12  ;;  %v1384_v33 = vadd.f32 1e-09, %v1380_v22  ;;  %1806 = vrcp.f32 %v1397_v51 }
 0x1b2   : > { %v1217_v21 = vpop.f32.mrf.mxu3  ;;  %v1182_v23 = vadd.f32 %v1181_v36, %v2551_v11  ;;  %v1387_v36 = vadd.f32 1e-09, %v1383_v52 }
 0x1b3   : > { %v1218_v31 = vadd.f32 %v1217_v21, %v2548_v13  ;;  %v1237_v13 = vmax.f32 %v1215_v28, 0.0  ;;  %v1398_v21 = vadd.f32 %v1394_v25, %v1386_v8 }
 0x1b4   : > { %v1251_v56 = vmax.f32 %v1182_v23, 0.0  ;;  %v1399_v16 = vadd.f32 %v1395_v9, %v1387_v36 }
 0x1b5   : > { %1335 = vmatpush.bf16.msrb.mxu0 %v1259_v3  ;;  %v1245_v47 = vmax.f32 %v1218_v31, 0.0  ;;  %1808 = vrcp.f32 %v1398_v21 }
 0x1b6   : > { %v1200_v38 = vpop.f32.mrf.mxu2  ;;  %v1268_v34 = vpack.c.bf16 %v1251_v56, %v1243_v43 }
 0x1b7   : > { %v1201_v46 = vadd.f32 %v1200_v38, %v2551_v11  ;;  %v1807_v15 = vpop.eup %1806 }
 0x1b8   : > { %1347 = vmatpush.bf16.msrb.mxu1 %v1268_v34  ;;  %1690 = vmatmul.msk.bf16.vlgmr.msrb.gmra.mxu0 %vm1063_vm9, %v2567_v37  ;;  %v1405_v38 = vmul.f32 %v1807_v15, %v1393_v44  ;;  %v1413_v3 = vmul.f32 %v1807_v15, %v1385_v42 }
 0x1b9   : > { %v1252_v10 = vmax.f32 %v1201_v46, 0.0 }
 0x1ba   : > { %v1219_v62 = vpop.f32.mrf.mxu3 }
 0x1bb   : > { %v1269_v30 = vpack.c.bf16 %v1252_v10, %v1244_v61  ;;  %v1220_v35 = vadd.f32 %v1219_v62, %v2551_v11  ;;  %v1262_v11 = vpack.c.bf16 %v1237_v13, %v1229_v63  ;;  %v1809_v5 = vpop.eup %1808 }
 0x1bc   : > { %1348 = vmatpush.bf16.msrb.mxu1 %v1260_v53  ;;  %v1414_v43 = vmul.f32 %v1809_v5, %v1386_v8  ;;  %v1406_v61 = vmul.f32 %v1809_v5, %v1394_v25 }
 0x1bd   : > { %1360 = vmatpush.bf16.msrb.mxu2 %v1269_v30  ;;  %v1253_v4 = vmax.f32 %v1220_v35, 0.0 }
 0x1bf   : > { %v1270_v6 = vpack.c.bf16 %v1253_v4, %v1245_v47  ;;  %1691 = vmatmul.msk.bf16.vlgmr.msrb.gmra.mxu1 %vm1063_vm9, %v2567_v37 }
 0x1c1   : > { %1361 = vmatpush.bf16.msrb.mxu2 %v1261_v1  ;;  %1373 = vmatpush.bf16.msrb.mxu3 %v1270_v6 }
 0x1c4   : > { %1692 = vmatmul.msk.bf16.vlgmr.msrb.gmra.mxu2 %vm1063_vm9, %v2567_v37 }
 0x1c5   : > { %1374 = vmatpush.bf16.msrb.mxu3 %v1262_v11 }
 0x1c8   : > { %1693 = vmatmul.msk.bf16.vlgmr.msrb.gmra.mxu3 %vm1063_vm9, %v2567_v37  ;;  %v1388_v37 = vand.u32 2147483647, %v2465_v58 }
 0x1ca   : > { %v1392_v2 = vadd.f32 1e-09, %v1388_v37 }
 0x1cc   : > { %v1396_v41 = vadd.f32 %v1392_v2, %v1384_v33 }
 0x1ce   : > { %1810 = vrcp.f32 %v1396_v41 }
 0x1cf   : > { %1812 = vrcp.f32 %v1399_v16 }
 0x1d4   : > { %v1811_v14 = vpop.eup %1810 }
 0x1d5   : > { %v1813_v50 = vpop.eup %1812  ;;  %v1404_v31 = vmul.f32 %v1811_v14, %v1392_v2  ;;  %v1412_v28 = vmul.f32 %v1811_v14, %v1384_v33 }
 0x1d6   : > { %v1407_v32 = vmul.f32 %v1813_v50, %v1395_v9  ;;  %v1415_v1 = vmul.f32 %v1813_v50, %v1387_v36 }
 0x211   : > { %v1285_v57 = vpop.f32.mrf.mxu0 }
 0x212   : > { %v1298_v29 = vpop.f32.mrf.mxu1  ;;  %v1286_v0 = vadd.f32 %v1285_v57, %v1272_v54 }
 0x213   : > { %v1299_v60 = vadd.f32 %v1298_v29, %v1272_v54 }
 0x214   : > { %v1408_v47 = vmul.f32 %v1404_v31, %v1286_v0 }
 0x215   : > { %v1409_v34 = vmul.f32 %v1405_v38, %v1299_v60 }
 0x219   : > { %v1287_v49 = vpop.f32.mrf.mxu0 }
 0x21a   : > { %v1300_v7 = vpop.f32.mrf.mxu1 }
 0x227   : > { %v1311_v27 = vpop.f32.mrf.mxu2 }
 0x228   : > { %v1312_v20 = vadd.f32 %v1311_v27, %v1272_v54 }
 0x22a   : > { %v1410_v35 = vmul.f32 %v1406_v61, %v1312_v20 }
 0x22b   : > { %v1324_v18 = vpop.f32.mrf.mxu3 }
 0x22c   : > { %v1325_v53 = vadd.f32 %v1324_v18, %v1272_v54 }
 0x22e   : > { %v1411_v57 = vmul.f32 %v1407_v32, %v1325_v53 }
 0x22f   : > { %v1313_v26 = vpop.f32.mrf.mxu2 }
 0x233   : > { %v1326_v24 = vpop.f32.mrf.mxu3 }
 0x235   : > { %v1337_v40 = vpop.f32.mrf.mxu0 }
 0x236   : > { %v1338_v55 = vadd.f32 %v1337_v40, %v1272_v54 }
 0x238   : > { %v1416_v11 = vmul.f32 %v1412_v28, %v1338_v55 }
 0x23a   : > { %v1420_v17 = vadd.f32 %v1416_v11, %v1408_v47 }
 0x23c   : > { %v1350_v58 = vpop.f32.mrf.mxu1 }
 0x23d   : > { %v1339_v23 = vpop.f32.mrf.mxu0  ;;  %v1351_v46 = vadd.f32 %v1350_v58, %v1272_v54 }
 0x23f   : > { %v1417_v30 = vmul.f32 %v1413_v3, %v1351_v46 }
 0x241   : > { %v1421_v13 = vadd.f32 %v1417_v30, %v1409_v34 }
 0x243   : > { %v1428_v49 = vrot.slane %v1421_v13, 7 }
 0x244   : > { %v1352_v48 = vpop.f32.mrf.mxu1 }
 0x245   : > { %v1432_v12 = vsel %vm1431_vm11, %v1420_v17, %v1428_v49 }
 0x247   : > { %v1363_v56 = vpop.f32.mrf.mxu2 }
 0x248   : > { %v1364_v10 = vadd.f32 %v1363_v56, %v1272_v54 }
 0x24a   : > { %v1418_v62 = vmul.f32 %v1414_v43, %v1364_v10 }
 0x24b   : > { %v1376_v4 = vpop.f32.mrf.mxu3 }
 0x24c   : > { %v1422_v6 = vadd.f32 %v1418_v62, %v1410_v35  ;;  %v1377_v63 = vadd.f32 %v1376_v4, %v1272_v54 }
 0x24e   : > { %v1419_v7 = vmul.f32 %v1415_v1, %v1377_v63  ;;  %v1429_v27 = vrot.slane %v1422_v6, 6 }
 0x24f   : > { %v1365_v29 = vpop.f32.mrf.mxu2 }
 0x250   : > { %v1423_v18 = vadd.f32 %v1419_v7, %v1411_v57 }
 0x252   : > { %v1430_v26 = vrot.slane %v1423_v18, 5 }
 0x253   : > { %v1378_v45 = vpop.f32.mrf.mxu3 }
 0x254   : > { %v1434_v42 = vsel %vm1433_vm14, %v1429_v27, %v1430_v26 }
 0x255   : > { %v1436_v39 = vsel %vm1435_vm0, %v1432_v12, %v1434_v42 }
 0x256   : > { %1442 = vst.msk [vmem:[%s283_s10] sm:$0xf] %vm1440_vm1, %v1436_v39 }
 0x257   : > { %1841 = shalt.err (!%p1838_p7)
}
 0x258   : > { %1720 = dma.vmem_to_hbm [thread:$0]  (%p2004_p3), %s1459_s17, 64, %s1461_s13, %s1444_s14  }
 0x259 PF: > { %p1726_p9 = scmp.ge.s32.totalorder %s1908_s30, 2  ;;  %s1472_s18 = sand.u32 1, %s1880_s23  }
 0x25a   : > { %s1473_s26 = scalar_lea.sflag [#allocation4], %s1472_s18 }
 0x25b   : > { %p1723_p10 = pnand %p1726_p9, %p2013_p8 }
 0x25d   : > { %p1724_p11 = pneg %p1723_p10 }
 0x25f   : > { %1875 = dma.done.wait (%p1724_p11), %s1473_s26, 64  }
 0x260   : > { %1877 = vsyncadd (%p1724_p11), %s1473_s26, 4294967232  ;;  %s20_s30 = sadd.s32 1, %s1908_s30   ;;  %s2677_s23 = smov %s1884_s24 }
 0x261   : > { %p17_p12 = scmp.ge.s32.totalorder %s20_s30, 6   ;;  %s2678_s24 = smov %s1888_s25 }
 0x262   : > { %s2679_s25 = smov %s2022_s16  ;;  %s2680_s26 = smov %s1900_s28 }
 0x263   : > { %s2681_s27 = smov %s1904_s29  ;;  %s2682_s28 = smov %s2685_s8 }
 0x264   : > { %s2683_s29 = smov %s2689_s9  ;;  %19 = sbr.rel (!%p17_p12) target bundleno = 7 (0x7), region = 82 }
 0x269   :  { %1479 = vsyncpa [#allocation4], 1 }
 0x26a   :  { %1481 = vsyncpa [#allocation4 + $0x1], 1 }

</bundles_post_ra>
